<compile_context>
chip_gen: v7x
topology: tpu7x:2x2x1
jax: 0.10.0
libtpu: 0.0.40
codegen_flags: <defaults>
</compile_context>

<pallas_src>
import functools
import math

import jax
import jax.numpy as jnp
from jax import lax
from jax.experimental import pallas as pl
from jax.experimental.pallas import tpu as pltpu


def _round_up(a: int, b: int) -> int:
    return (a + b - 1) // b * b


def _pe_kernel(e_ref, x_ref, out_ref, *, d_model: int):
    # e_ref:   (W, W*d_model) f32  expansion matrix pre-scaled by div_term:
    #                              E[j, k*d_model + c] = div_term[c//2] * (j == k)
    # x_ref:   (TR, W)        i32  timestep indices, W positions per row
    # out_ref: (TR, W*d_model)     interleaved sin/cos; row-major == (TR*W, d_model)
    ld = out_ref.shape[-1]
    pos = x_ref[...].astype(jnp.float32)                       # (TR, W)
    # MXU does lane expansion + frequency scaling in one shot:
    #   angle[r, k*d_model + c] = x[r, k] * div_term[c//2]
    angle = jnp.dot(pos, e_ref[...], preferred_element_type=jnp.float32)
    # cos(a) == sin(a + pi/2): single fused sin pass, one unmasked full store.
    cp = lax.broadcasted_iota(jnp.int32, (1, ld), 1)
    phase = ((cp % d_model) % 2).astype(jnp.float32) * jnp.float32(math.pi / 2)
    out_ref[...] = jnp.sin(angle + phase).astype(out_ref.dtype)


def _expansion_matrix(w: int, d_model: int):
    # E[j, k*d_model + c] = div_term[c // 2] if j == k else 0
    ld = w * d_model
    j = lax.broadcasted_iota(jnp.int32, (w, ld), 0)
    cp = lax.broadcasted_iota(jnp.int32, (w, ld), 1)
    c = cp % d_model
    k = cp // d_model
    div = jnp.exp((c - (c % 2)).astype(jnp.float32)
                  * jnp.float32(-math.log(10000.0) / d_model))
    return jnp.where(j == k, div, jnp.float32(0.0))


def _pe_jnp(x_flat, d_model: int):
    # Closed-form pure-jnp path for tiny inputs; XLA fuses it into the graph.
    pos = x_flat.astype(jnp.float32)[:, None]                           # (N, 1)
    k = jnp.arange(d_model // 2, dtype=jnp.float32)
    div = jnp.exp(k * jnp.float32(-2.0 * math.log(10000.0) / d_model))  # (d/2,)
    ang = pos * div                                                     # (N, d/2)
    return jnp.stack([jnp.sin(ang), jnp.cos(ang)], axis=-1).reshape(
        x_flat.shape[0], d_model)


def positional_encoding_1d(x, d_model: int = 8, length: int = 500, *,
                           use_pallas=None, out_dtype=jnp.float32,
                           vmem_budget_bytes: int = 8 << 20,
                           block_rows=None):
    """JAX/Pallas equivalent of PositionalEncoding1D(d_model, length)(x).

    x: integer timestep indices of any shape; returns x.shape + (d_model,).
    Negative indices wrap like torch (pe[-k] == pe[length-k]).
    # TODO(synk): torch raises on x >= length; here out-of-range indices are
    # computed without a bounds check.
    """
    if d_model % 2 != 0:
        raise ValueError(
            "Cannot use sin/cos positional encoding with odd dim "
            "(got dim={:d})".format(d_model))

    x = jnp.asarray(x).astype(jnp.int32)
    orig_shape = x.shape
    n = int(x.size)
    if n == 0:                                   # empty-input edge case
        return jnp.zeros(orig_shape + (d_model,), out_dtype)

    x_flat = x.reshape(n)
    x_flat = jnp.where(x_flat < 0, x_flat + length, x_flat)  # torch neg-index

    if use_pallas is None:
        use_pallas = n >= 16384                  # launch/pad overhead below this
    if not use_pallas:
        return _pe_jnp(x_flat, d_model).astype(out_dtype).reshape(
            orig_shape + (d_model,))

    # W positions per row; keeps the expansion matrix (W, W*d_model) small and
    # the output lane width (W*d_model) a dense multiple of 128 for typical
    # d_model (=8 -> W=128, lane width 1024).
    w = max(8, min(128, 1024 // d_model))
    ld = w * d_model
    n_pad = _round_up(n, w)
    r_total = n_pad // w

    # Rows per grid step: sized against a double-buffered VMEM budget; keep
    # >= 2 steps when the input is big enough so both v7x TensorCores work.
    row_bytes = w * 4 + ld * 4                   # idx row + output row, f32
    if block_rows is None:
        tr = max(8, min(512, vmem_budget_bytes // (2 * row_bytes)))
        tr = (tr // 8) * 8
        if r_total <= tr and r_total >= 16:
            tr = _round_up(pl.cdiv(r_total, 2), 8)
    else:
        tr = int(block_rows)
    if tr >= r_total:
        tr = r_total                             # full extent: any size is legal
    elif tr % 8 != 0:
        tr = max(8, (tr // 8) * 8)               # partial blocks must be 8-aligned
    grid = (pl.cdiv(r_total, tr),)

    x_rows = jnp.pad(x_flat, (0, n_pad - n)).reshape(r_total, w)
    e_mat = _expansion_matrix(w, d_model)        # fetched once per core

    out2d = pl.pallas_call(
        functools.partial(_pe_kernel, d_model=d_model),
        out_shape=jax.ShapeDtypeStruct((r_total, ld), out_dtype),
        grid=grid,
        in_specs=[
            pl.BlockSpec((w, ld), lambda i: (0, 0)),   # expansion matrix (const)
            pl.BlockSpec((tr, w), lambda i: (i, 0)),   # indices
        ],
        out_specs=pl.BlockSpec((tr, ld), lambda i: (i, 0)),
        compiler_params=pltpu.CompilerParams(
            dimension_semantics=("parallel",)),
    )(e_mat, x_rows)

    # Free (row-major) reshape: (n_pad/W, W*d_model) == (n_pad, d_model).
    pe = out2d.reshape(n_pad, d_model)
    if n_pad != n:
        pe = pe[:n]
    return pe.reshape(orig_shape + (d_model,))


def _reference(x, d_model=8, length=500):
    """Pure-JAX reference mirroring the torch code (table build + gather)."""
    pos = jnp.arange(length, dtype=jnp.float32)[:, None]
    div_term = jnp.exp(
        jnp.arange(0, d_model, 2, dtype=jnp.float32)
        * -(math.log(10000.0) / d_model))
    pe = jnp.zeros((length, d_model), dtype=jnp.float32)
    pe = pe.at[:, 0::2].set(jnp.sin(pos * div_term))
    pe = pe.at[:, 1::2].set(jnp.cos(pos * div_term))
    idx = jnp.asarray(x, jnp.int32)
    idx = jnp.where(idx < 0, idx + length, idx)   # torch negative-index wrap
    return pe[idx]


if __name__ == "__main__":
    d_model, length = 8, 500
    key = jax.random.PRNGKey(0)
    k1, k2, k3 = jax.random.split(key, 3)

    # Case 1: typical diffusion-timestep workload -- small batch of indices
    # (single block, tr == r_total == 1).
    x_small = jax.random.randint(k1, (8,), 0, length, dtype=jnp.int32)
    out_small = jax.block_until_ready(
        positional_encoding_1d(x_small, d_model, length, use_pallas=True))
    ref_small = _reference(x_small, d_model, length)
    assert out_small.shape == (8, d_model), out_small.shape
    assert out_small.dtype == jnp.float32
    assert jnp.allclose(out_small, ref_small, atol=2e-4, rtol=1e-4), "mismatch (small)"

    # Case 2: 16x128 indices (incl. negatives) -> default tiling splits into
    # 2 balanced grid steps (two-core heuristic).
    x_mid = jax.random.randint(k2, (16, 128), -length, length, dtype=jnp.int32)
    out_mid = jax.block_until_ready(
        positional_encoding_1d(x_mid, d_model, length, use_pallas=True))
    ref_mid = _reference(x_mid, d_model, length)
    assert out_mid.shape == (16, 128, d_model), out_mid.shape
    assert jnp.allclose(out_mid, ref_mid, atol=2e-4, rtol=1e-4), "mismatch (mid)"

    # Case 3: N not a multiple of the tile -> multi-step grid with a ragged
    # last block + tail slice in the wrapper.
    x_big = jax.random.randint(k3, (2500,), 0, length, dtype=jnp.int32)
    out_big = jax.block_until_ready(
        positional_encoding_1d(x_big, d_model, length, use_pallas=True,
                               block_rows=8))
    ref_big = _reference(x_big, d_model, length)
    assert out_big.shape == (2500, d_model), out_big.shape
    assert jnp.allclose(out_big, ref_big, atol=2e-4, rtol=1e-4), "mismatch (big)"

    # Case 4: bf16 output knob (v5e bandwidth option) -- smoke test only.
    out_bf16 = jax.block_until_ready(
        positional_encoding_1d(x_mid, d_model, length, use_pallas=True,
                               out_dtype=jnp.bfloat16))
    assert out_bf16.shape == (16, 128, d_model)
    assert out_bf16.dtype == jnp.bfloat16

    # Case 5: empty input edge case.
    out_empty = positional_encoding_1d(jnp.zeros((0,), jnp.int32), d_model, length)
    assert out_empty.shape == (0, d_model)

    print("KERNEL_OK")
</pallas_src>

<mosaic_0001>
module attributes {stable_mosaic.version = 11 : i64} {
  func.func @_pe_kernel(%arg0: i32, %arg1: memref<128x1024xf32, #tpu.memory_space<vmem>>, %arg2: memref<1x128xi32, #tpu.memory_space<vmem>>, %arg3: memref<1x1024xf32, #tpu.memory_space<vmem>>) attributes {dimension_semantics = [#tpu.dimension_semantics<parallel>], iteration_bounds = array<i64: 1>, scalar_prefetch = 0 : i64, scratch_operands = 0 : i64, tpu.core_type = #tpu.core_type<tc>, window_params = [{pipeline_mode = #tpu.pipeline_mode<synchronous>, transform_indices = @transform_0, window_bounds = array<i64: 128, 1024>}, {transform_indices = @transform_1, window_bounds = array<i64: 1, 128>}, {transform_indices = @transform_2, window_bounds = array<i64: 1, 1024>}]} {
    %c0 = arith.constant 0 : index
    %c0_0 = arith.constant 0 : index
    %0 = vector.load %arg2[%c0, %c0_0] : memref<1x128xi32, #tpu.memory_space<vmem>>, vector<1x128xi32>
    %1 = arith.sitofp %0 : vector<1x128xi32> to vector<1x128xf32>
    %c0_1 = arith.constant 0 : index
    %c0_2 = arith.constant 0 : index
    %2 = vector.load %arg1[%c0_1, %c0_2] : memref<128x1024xf32, #tpu.memory_space<vmem>>, vector<128x1024xf32>
    %cst = arith.constant dense<0.000000e+00> : vector<1x1024xf32>
    %3 = tpu.matmul %1, %2, %cst {dimension_numbers = #tpu.dot_dimension_numbers<[1], [0], [0], [1], [0, 0, 1, 1], [], []>} : vector<1x128xf32>, vector<128x1024xf32>, vector<1x1024xf32> -> vector<1x1024xf32>
    %4 = tpu.iota {dimensions = array<i32: 1>} : vector<1x1024xi32>
    %c8_i32 = arith.constant 8 : i32
    %c0_i32 = arith.constant 0 : i32
    %5 = arith.cmpi eq, %c8_i32, %c0_i32 : i32
    %c1_i32 = arith.constant 1 : i32
    %6 = arith.select %5, %c1_i32, %c8_i32 : i32
    %7 = vector.broadcast %6 : i32 to vector<1x1024xi32>
    %8 = arith.remsi %4, %7 : vector<1x1024xi32>
    %c0_i32_3 = arith.constant 0 : i32
    %9 = vector.broadcast %c0_i32_3 : i32 to vector<1x1024xi32>
    %10 = arith.cmpi ne, %8, %9 : vector<1x1024xi32>
    %c0_i32_4 = arith.constant 0 : i32
    %11 = vector.broadcast %c0_i32_4 : i32 to vector<1x1024xi32>
    %12 = arith.cmpi slt, %8, %11 : vector<1x1024xi32>
    %c0_i32_5 = arith.constant 0 : i32
    %13 = arith.cmpi slt, %6, %c0_i32_5 : i32
    %14 = vector.broadcast %13 : i1 to vector<1x1024xi1>
    %15 = vector.broadcast %14 : vector<1x1024xi1> to vector<1x1024xi1>
    %16 = arith.xori %12, %15 : vector<1x1024xi1>
    %17 = arith.andi %16, %10 : vector<1x1024xi1>
    %18 = vector.broadcast %6 : i32 to vector<1x1024xi32>
    %19 = arith.addi %8, %18 : vector<1x1024xi32>
    %20 = arith.select %17, %19, %8 : vector<1x1024xi1>, vector<1x1024xi32>
    %c2_i32 = arith.constant 2 : i32
    %c0_i32_6 = arith.constant 0 : i32
    %21 = arith.cmpi eq, %c2_i32, %c0_i32_6 : i32
    %c1_i32_7 = arith.constant 1 : i32
    %22 = arith.select %21, %c1_i32_7, %c2_i32 : i32
    %23 = vector.broadcast %22 : i32 to vector<1x1024xi32>
    %24 = arith.remsi %20, %23 : vector<1x1024xi32>
    %c0_i32_8 = arith.constant 0 : i32
    %25 = vector.broadcast %c0_i32_8 : i32 to vector<1x1024xi32>
    %26 = arith.cmpi ne, %24, %25 : vector<1x1024xi32>
    %c0_i32_9 = arith.constant 0 : i32
    %27 = vector.broadcast %c0_i32_9 : i32 to vector<1x1024xi32>
    %28 = arith.cmpi slt, %24, %27 : vector<1x1024xi32>
    %c0_i32_10 = arith.constant 0 : i32
    %29 = arith.cmpi slt, %22, %c0_i32_10 : i32
    %30 = vector.broadcast %29 : i1 to vector<1x1024xi1>
    %31 = vector.broadcast %30 : vector<1x1024xi1> to vector<1x1024xi1>
    %32 = arith.xori %28, %31 : vector<1x1024xi1>
    %33 = arith.andi %32, %26 : vector<1x1024xi1>
    %34 = vector.broadcast %22 : i32 to vector<1x1024xi32>
    %35 = arith.addi %24, %34 : vector<1x1024xi32>
    %36 = arith.select %33, %35, %24 : vector<1x1024xi1>, vector<1x1024xi32>
    %37 = arith.sitofp %36 : vector<1x1024xi32> to vector<1x1024xf32>
    %cst_11 = arith.constant 1.57079637 : f32
    %38 = vector.broadcast %cst_11 : f32 to vector<1x1024xf32>
    %39 = arith.mulf %37, %38 : vector<1x1024xf32>
    %40 = arith.addf %3, %39 : vector<1x1024xf32>
    %41 = math.sin %40 : vector<1x1024xf32>
    %c0_12 = arith.constant 0 : index
    %c0_13 = arith.constant 0 : index
    %42 = vector.load %arg3[%c0_12, %c0_13] : memref<1x1024xf32, #tpu.memory_space<vmem>>, vector<1x1024xf32>
    tpu.vector_store %arg3[%c0_12, %c0_13], %41 {strides = array<i32>} : memref<1x1024xf32, #tpu.memory_space<vmem>>, vector<1x1024xf32>,
    return
  }
  func.func @transform_0(%arg0: i32) -> (i32, i32) {
    %c0_i32 = arith.constant 0 : i32
    %c0_i32_0 = arith.constant 0 : i32
    %c0_i32_1 = arith.constant 0 : i32
    return %c0_i32, %c0_i32_0 : i32, i32
  }
  func.func @transform_1(%arg0: i32) -> (i32, i32) {
    %c0_i32 = arith.constant 0 : i32
    %c0_i32_0 = arith.constant 0 : i32
    return %arg0, %c0_i32 : i32, i32
  }
  func.func @transform_2(%arg0: i32) -> (i32, i32) {
    %c0_i32 = arith.constant 0 : i32
    %c0_i32_0 = arith.constant 0 : i32
    return %arg0, %c0_i32 : i32, i32
  }
}

</mosaic_0001>

<bundles_post_ra>
// kernel: tpu_custom_call.1
= control target key start
LH: loop header
LB: loop body
LE: loop exit
PB: predicated region body
PF: predicated region fallthrough
CT: control target
= control target key end

     0   :  { %7 = vsyncpa [#allocation3], 0  ;;  %s2632_s0 = inlined_call_operand.hbm [shape: f32[128,1024], index: 0, kind: input, shape index: {}]   ;;  %s2633_s1 = inlined_call_operand.vmem [shape: s32[1,128], index: 1, kind: input, shape index: {}]   ;;  %s2634_s2 = inlined_call_operand.hbm [shape: f32[1,1024], index: 2, kind: output, shape index: {}]  }
   0x1   :  { %8 = vsyncpa [#allocation4], 0  ;;  %s1847_s9 = smov [#allocation2]   ;;  %s1799_s13 = scalar_lea.hbm %s2632_s0, 16384 }
   0x2   :  { %s14_s10 = sshll.u32 %s1847_s9, 4  ;;  %p1800_p0 = scmp.ne.s32.totalorder %s2632_s0, %s1799_s13  ;;  %s15_s10 = int_to_ptr.vmem [resolvable:$true] %s14_s10 }
   0x3   :  { %p1803_p1 = scmp.lt.u32.totalorder %s1799_s13, %s2632_s0 }
   0x5   :  { %p1805_p2 = pnand %p1803_p1, %p1800_p0 }
   0x7   :  { %1808 = shalt.err (!%p1805_p2)
}
   0x8   :  { %s1809_s18 = scalar_lea.vmem %s15_s10, 16384  ;;  %p1814_p4 = scmp.lt.s32.totalorder %s15_s10, %s15_s10 }
   0x9   :  { %p1810_p3 = scmp.ne.s32.totalorder %s15_s10, %s1809_s18  ;;  %p1815_p5 = scmp.lt.s32.totalorder %s1809_s18, %s1809_s18 }
   0xb   :  { %p1816_p6 = por %p1815_p5, %p1814_p4 }
   0xd   :  { %p1817_p7 = pnand %p1816_p6, %p1810_p3 }
   0xf   :  { %1820 = shalt.err (!%p1817_p7)
}
  0x10   :  { %s1848_s19 = smov 1024   ;;  %s1849_s20 = smov 64  }
  0x11   :  { %20 = dma.hbm_to_vmem [thread:$0]  %s2632_s0, 16384, %s15_s10, [#allocation3], %s1848_s19, %s1848_s19, %s1849_s20  }
  0x12   :  { %1843 = dma.done.wait [#allocation3], 16384  }
  0x13   :  { %1844 = vsyncadd [#allocation3], 4294950912  ;;  %v1850_v0 = vmov 0.0   ;;  %v29_v1 = vld [vmem:[#allocation2 + $0x8] sm:$0xff]  ;;  %v31_v3 = vld [vmem:[#allocation2 + $0x18] sm:$0xff] }
  0x14   :  { %437 = vmatprep.mubr.f32.mxu0 %v1850_v0  ;;  %508 = vmatprep.mubr.f32.mxu1 %v1850_v0  ;;  %v37_v2 = vld [vmem:[#allocation2 + $0x48] sm:$0xff]  ;;  %v39_v5 = vld [vmem:[#allocation2 + $0x58] sm:$0xff]  ;;  %v28_v6 = vld [vmem:[#allocation2] sm:$0xff] }
  0x15   :  { %v1595_v4 = vpack.c.bf16 %v37_v2, %v29_v1  ;;  %v36_v7 = vld [vmem:[#allocation2 + $0x40] sm:$0xff]  ;;  %v1627_v8 = vpack.c.bf16 %v39_v5, %v31_v3  ;;  %v30_v10 = vld [vmem:[#allocation2 + $0x10] sm:$0xff]  ;;  %v45_v12 = vld [vmem:[#allocation2 + $0x88] sm:$0xff] }
  0x16   :  { %v1597_v9 = vpack.c.bf16 %v36_v7, %v28_v6  ;;  %v38_v11 = vld [vmem:[#allocation2 + $0x50] sm:$0xff]  ;;  %v53_v14 = vld [vmem:[#allocation2 + $0xc8] sm:$0xff]  ;;  %v47_v15 = vld [vmem:[#allocation2 + $0x98] sm:$0xff] }
  0x17   :  { %1596 = vmatprep.subr.bf16.mxu0 %v1595_v4  ;;  %v1629_v13 = vpack.c.bf16 %v38_v11, %v30_v10  ;;  %v55_v16 = vld [vmem:[#allocation2 + $0xd8] sm:$0xff]  ;;  %1628 = vmatprep.subr.bf16.mxu1 %v1627_v8  ;;  %v1599_v17 = vpack.c.bf16 %v53_v14, %v45_v12  ;;  %v44_v19 = vld [vmem:[#allocation2 + $0x80] sm:$0xff]  ;;  %v46_v21 = vld [vmem:[#allocation2 + $0x90] sm:$0xff] }
  0x18   :  { %1598 = vmatpush1.bf16.msra.mxu0 %v1597_v9  ;;  %v1631_v18 = vpack.c.bf16 %v55_v16, %v47_v15  ;;  %v52_v20 = vld [vmem:[#allocation2 + $0xc0] sm:$0xff]  ;;  %v54_v23 = vld [vmem:[#allocation2 + $0xd0] sm:$0xff]  ;;  %v61_v24 = vld [vmem:[#allocation2 + $0x108] sm:$0xff] }
  0x19   :  { %1630 = vmatpush1.bf16.msra.mxu1 %v1629_v13  ;;  %v1601_v22 = vpack.c.bf16 %v52_v20, %v44_v19  ;;  %v69_v25 = vld [vmem:[#allocation2 + $0x148] sm:$0xff]  ;;  %1600 = vmatprep.subr.bf16.mxu0 %v1599_v17  ;;  %v1633_v26 = vpack.c.bf16 %v54_v23, %v46_v21  ;;  %v63_v28 = vld [vmem:[#allocation2 + $0x118] sm:$0xff]  ;;  %v60_v30 = vld [vmem:[#allocation2 + $0x100] sm:$0xff] }
  0x1a   :  { %1632 = vmatprep.subr.bf16.mxu1 %v1631_v18  ;;  %v1603_v27 = vpack.c.bf16 %v69_v25, %v61_v24  ;;  %v71_v29 = vld [vmem:[#allocation2 + $0x158] sm:$0xff]  ;;  %v68_v32 = vld [vmem:[#allocation2 + $0x140] sm:$0xff]  ;;  %v62_v33 = vld [vmem:[#allocation2 + $0x110] sm:$0xff] }
  0x1b   :  { %v1635_v31 = vpack.c.bf16 %v71_v29, %v63_v28  ;;  %v70_v34 = vld [vmem:[#allocation2 + $0x150] sm:$0xff]  ;;  %v1605_v35 = vpack.c.bf16 %v68_v32, %v60_v30  ;;  %v77_v36 = vld [vmem:[#allocation2 + $0x188] sm:$0xff]  ;;  %v79_v38 = vld [vmem:[#allocation2 + $0x198] sm:$0xff] }
  0x1c   :  { %1602 = vmatpush1.bf16.msra.mxu0 %v1601_v22  ;;  %v85_v37 = vld [vmem:[#allocation2 + $0x1c8] sm:$0xff]  ;;  %v1637_v39 = vpack.c.bf16 %v70_v34, %v62_v33  ;;  %v87_v41 = vld [vmem:[#allocation2 + $0x1d8] sm:$0xff]  ;;  %v76_v42 = vld [vmem:[#allocation2 + $0x180] sm:$0xff] }
  0x1d   :  { %1634 = vmatpush1.bf16.msra.mxu1 %v1633_v26  ;;  %1604 = vmatprep.subr.bf16.mxu0 %v1603_v27  ;;  %v1607_v40 = vpack.c.bf16 %v85_v37, %v77_v36  ;;  %v84_v43 = vld [vmem:[#allocation2 + $0x1c0] sm:$0xff]  ;;  %v1639_v44 = vpack.c.bf16 %v87_v41, %v79_v38  ;;  %v78_v45 = vld [vmem:[#allocation2 + $0x190] sm:$0xff]  ;;  %v93_v47 = vld [vmem:[#allocation2 + $0x208] sm:$0xff] }
  0x1e   :  { %1636 = vmatprep.subr.bf16.mxu1 %v1635_v31  ;;  %v86_v46 = vld [vmem:[#allocation2 + $0x1d0] sm:$0xff]  ;;  %v101_v48 = vld [vmem:[#allocation2 + $0x248] sm:$0xff]  ;;  %v95_v49 = vld [vmem:[#allocation2 + $0x218] sm:$0xff]  ;;  %v1609_v51 = vpack.c.bf16 %v84_v43, %v76_v42 }
  0x1f   :  { %v103_v50 = vld [vmem:[#allocation2 + $0x258] sm:$0xff]  ;;  %v1641_v52 = vpack.c.bf16 %v86_v46, %v78_v45  ;;  %v1611_v53 = vpack.c.bf16 %v101_v48, %v93_v47  ;;  %v92_v54 = vld [vmem:[#allocation2 + $0x200] sm:$0xff]  ;;  %v94_v56 = vld [vmem:[#allocation2 + $0x210] sm:$0xff] }
  0x20   :  { %1606 = vmatpush1.bf16.msra.mxu0 %v1605_v35  ;;  %v100_v55 = vld [vmem:[#allocation2 + $0x240] sm:$0xff]  ;;  %v1643_v57 = vpack.c.bf16 %v103_v50, %v95_v49  ;;  %v102_v58 = vld [vmem:[#allocation2 + $0x250] sm:$0xff]  ;;  %v109_v59 = vld [vmem:[#allocation2 + $0x288] sm:$0xff] }
  0x21   :  { %1638 = vmatpush1.bf16.msra.mxu1 %v1637_v39  ;;  %1608 = vmatprep.subr.bf16.mxu0 %v1607_v40  ;;  %v117_v60 = vld [vmem:[#allocation2 + $0x2c8] sm:$0xff]  ;;  %v111_v61 = vld [vmem:[#allocation2 + $0x298] sm:$0xff]  ;;  %v1613_v63 = vpack.c.bf16 %v100_v55, %v92_v54  ;;  %v1645_v1 = vpack.c.bf16 %v102_v58, %v94_v56  ;;  %v108_v3 = vld [vmem:[#allocation2 + $0x280] sm:$0xff] }
  0x22   :  { %1640 = vmatprep.subr.bf16.mxu1 %v1639_v44  ;;  %v119_v62 = vld [vmem:[#allocation2 + $0x2d8] sm:$0xff]  ;;  %v1615_v2 = vpack.c.bf16 %v117_v60, %v109_v59  ;;  %v116_v4 = vld [vmem:[#allocation2 + $0x2c0] sm:$0xff]  ;;  %v110_v5 = vld [vmem:[#allocation2 + $0x290] sm:$0xff] }
  0x23   :  { %v1647_v6 = vpack.c.bf16 %v119_v62, %v111_v61  ;;  %v118_v7 = vld [vmem:[#allocation2 + $0x2d0] sm:$0xff]  ;;  %v125_v8 = vld [vmem:[#allocation2 + $0x308] sm:$0xff]  ;;  %v127_v10 = vld [vmem:[#allocation2 + $0x318] sm:$0xff]  ;;  %v1617_v12 = vpack.c.bf16 %v116_v4, %v108_v3 }
  0x24   :  { %1610 = vmatpush1.bf16.msra.mxu0 %v1609_v51  ;;  %v133_v9 = vld [vmem:[#allocation2 + $0x348] sm:$0xff]  ;;  %v135_v11 = vld [vmem:[#allocation2 + $0x358] sm:$0xff]  ;;  %v1649_v13 = vpack.c.bf16 %v118_v7, %v110_v5  ;;  %v124_v15 = vld [vmem:[#allocation2 + $0x300] sm:$0xff] }
  0x25   :  { %1642 = vmatpush1.bf16.msra.mxu1 %v1641_v52  ;;  %1612 = vmatprep.subr.bf16.mxu0 %v1611_v53  ;;  %v1619_v14 = vpack.c.bf16 %v133_v9, %v125_v8  ;;  %v132_v16 = vld [vmem:[#allocation2 + $0x340] sm:$0xff]  ;;  %v126_v17 = vld [vmem:[#allocation2 + $0x310] sm:$0xff]  ;;  %v1651_v18 = vpack.c.bf16 %v135_v11, %v127_v10  ;;  %v141_v20 = vld [vmem:[#allocation2 + $0x388] sm:$0xff] }
  0x26   :  { %1644 = vmatprep.subr.bf16.mxu1 %v1643_v57  ;;  %v134_v19 = vld [vmem:[#allocation2 + $0x350] sm:$0xff]  ;;  %v149_v21 = vld [vmem:[#allocation2 + $0x3c8] sm:$0xff]  ;;  %v143_v22 = vld [vmem:[#allocation2 + $0x398] sm:$0xff]  ;;  %v1621_v24 = vpack.c.bf16 %v132_v16, %v124_v15 }
  0x27   :  { %v151_v23 = vld [vmem:[#allocation2 + $0x3d8] sm:$0xff]  ;;  %v1653_v25 = vpack.c.bf16 %v134_v19, %v126_v17  ;;  %v1623_v26 = vpack.c.bf16 %v149_v21, %v141_v20  ;;  %v140_v27 = vld [vmem:[#allocation2 + $0x380] sm:$0xff]  ;;  %v142_v29 = vld [vmem:[#allocation2 + $0x390] sm:$0xff] }
  0x28   :  { %1614 = vmatpush1.bf16.msra.mxu0 %v1613_v63  ;;  %v148_v28 = vld [vmem:[#allocation2 + $0x3c0] sm:$0xff]  ;;  %v1655_v30 = vpack.c.bf16 %v151_v23, %v143_v22  ;;  %v150_v31 = vld [vmem:[#allocation2 + $0x3d0] sm:$0xff]  ;;  %v33_v32 = vld [vmem:[#allocation2 + $0x28] sm:$0xff] }
  0x29   :  { %1646 = vmatpush1.bf16.msra.mxu1 %v1645_v1  ;;  %1616 = vmatprep.subr.bf16.mxu0 %v1615_v2  ;;  %v41_v33 = vld [vmem:[#allocation2 + $0x68] sm:$0xff]  ;;  %v35_v34 = vld [vmem:[#allocation2 + $0x38] sm:$0xff]  ;;  %v1625_v36 = vpack.c.bf16 %v148_v28, %v140_v27  ;;  %v26_v37 = vld [vmem:[%s2633_s1] sm:$0x1]  ;;  %v1657_v38 = vpack.c.bf16 %v150_v31, %v142_v29  ;;  %s1858_s1 = smov [#allocation5]  }
  0x2a   :  { %1648 = vmatprep.subr.bf16.mxu1 %v1647_v6  ;;  %v43_v35 = vld [vmem:[#allocation2 + $0x78] sm:$0xff]  ;;  %v1659_v39 = vpack.c.bf16 %v41_v33, %v33_v32  ;;  %v32_v40 = vld [vmem:[#allocation2 + $0x20] sm:$0xff]  ;;  %v34_v42 = vld [vmem:[#allocation2 + $0x30] sm:$0xff]  ;;  %v1891_v47 = vcvt.s32.f32 %v26_v37  ;;  %s1554_s24 = sshll.u32 %s1858_s1, 4  ;;  %s1555_s24 = int_to_ptr.vmem [resolvable:$true] %s1554_s24 }
  0x2b   :  { %v40_v41 = vld [vmem:[#allocation2 + $0x60] sm:$0xff]  ;;  %v1691_v43 = vpack.c.bf16 %v43_v35, %v35_v34  ;;  %v42_v44 = vld [vmem:[#allocation2 + $0x70] sm:$0xff]  ;;  %v49_v45 = vld [vmem:[#allocation2 + $0xa8] sm:$0xff]  ;;  %s1821_s25 = scalar_lea.vmem %s1555_s24, 128  ;;  %p1826_p9 = scmp.lt.s32.totalorder %s1555_s24, %s1555_s24 }
  0x2c   :  { %1618 = vmatpush1.bf16.msra.mxu0 %v1617_v12  ;;  %v57_v46 = vld [vmem:[#allocation2 + $0xe8] sm:$0xff]  ;;  %v51_v48 = vld [vmem:[#allocation2 + $0xb8] sm:$0xff]  ;;  %v1661_v50 = vpack.c.bf16 %v40_v41, %v32_v40  ;;  %v1693_v51 = vpack.c.bf16 %v42_v44, %v34_v42  ;;  %v48_v53 = vld [vmem:[#allocation2 + $0xa0] sm:$0xff]  ;;  %p1822_p8 = scmp.ne.s32.totalorder %s1555_s24, %s1821_s25  ;;  %p1827_p10 = scmp.lt.s32.totalorder %s1821_s25, %s1821_s25 }
  0x2d   :  { %1650 = vmatpush1.bf16.msra.mxu1 %v1649_v13  ;;  %1620 = vmatprep.subr.bf16.mxu0 %v1619_v14  ;;  %v59_v49 = vld [vmem:[#allocation2 + $0xf8] sm:$0xff]  ;;  %v1663_v52 = vpack.c.bf16 %v57_v46, %v49_v45  ;;  %v56_v54 = vld [vmem:[#allocation2 + $0xe0] sm:$0xff]  ;;  %v50_v55 = vld [vmem:[#allocation2 + $0xb0] sm:$0xff] }
  0x2e   :  { %1652 = vmatprep.subr.bf16.mxu1 %v1651_v18  ;;  %v1695_v56 = vpack.c.bf16 %v59_v49, %v51_v48  ;;  %v58_v57 = vld [vmem:[#allocation2 + $0xf0] sm:$0xff]  ;;  %v65_v58 = vld [vmem:[#allocation2 + $0x128] sm:$0xff]  ;;  %v67_v60 = vld [vmem:[#allocation2 + $0x138] sm:$0xff]  ;;  %v1665_v62 = vpack.c.bf16 %v56_v54, %v48_v53  ;;  %p1828_p11 = por %p1827_p10, %p1826_p9 }
  0x2f   :  { %v73_v59 = vld [vmem:[#allocation2 + $0x168] sm:$0xff]  ;;  %v75_v61 = vld [vmem:[#allocation2 + $0x178] sm:$0xff]  ;;  %v1697_v63 = vpack.c.bf16 %v58_v57, %v50_v55  ;;  %v64_v2 = vld [vmem:[#allocation2 + $0x120] sm:$0xff] }
  0x30   :  { %1622 = vmatpush1.bf16.msra.mxu0 %v1621_v24  ;;  %v1667_v1 = vpack.c.bf16 %v73_v59, %v65_v58  ;;  %v72_v3 = vld [vmem:[#allocation2 + $0x160] sm:$0xff]  ;;  %v66_v4 = vld [vmem:[#allocation2 + $0x130] sm:$0xff]  ;;  %v1699_v5 = vpack.c.bf16 %v75_v61, %v67_v60  ;;  %v81_v7 = vld [vmem:[#allocation2 + $0x1a8] sm:$0xff]  ;;  %p1829_p12 = pnand %p1828_p11, %p1822_p8 }
  0x31   :  { %1654 = vmatpush1.bf16.msra.mxu1 %v1653_v25  ;;  %1624 = vmatprep.subr.bf16.mxu0 %v1623_v26  ;;  %v74_v6 = vld [vmem:[#allocation2 + $0x170] sm:$0xff]  ;;  %v89_v8 = vld [vmem:[#allocation2 + $0x1e8] sm:$0xff]  ;;  %v83_v9 = vld [vmem:[#allocation2 + $0x1b8] sm:$0xff]  ;;  %v1669_v11 = vpack.c.bf16 %v72_v3, %v64_v2 }
  0x32   :  { %1656 = vmatprep.subr.bf16.mxu1 %v1655_v30  ;;  %v91_v10 = vld [vmem:[#allocation2 + $0x1f8] sm:$0xff]  ;;  %v1701_v12 = vpack.c.bf16 %v74_v6, %v66_v4  ;;  %v1671_v13 = vpack.c.bf16 %v89_v8, %v81_v7  ;;  %v80_v14 = vld [vmem:[#allocation2 + $0x1a0] sm:$0xff]  ;;  %v82_v16 = vld [vmem:[#allocation2 + $0x1b0] sm:$0xff]  ;;  %v2635_v6 = vlaneseq }
  0x33   :  { %v88_v15 = vld [vmem:[#allocation2 + $0x1e0] sm:$0xff]  ;;  %v1703_v17 = vpack.c.bf16 %v91_v10, %v83_v9  ;;  %v90_v18 = vld [vmem:[#allocation2 + $0x1f0] sm:$0xff]  ;;  %v97_v19 = vld [vmem:[#allocation2 + $0x228] sm:$0xff] }
  0x34   :  { %1626 = vmatpush1.bf16.msra.mxu0 %v1625_v36  ;;  %v105_v20 = vld [vmem:[#allocation2 + $0x268] sm:$0xff]  ;;  %v99_v21 = vld [vmem:[#allocation2 + $0x238] sm:$0xff]  ;;  %v1673_v23 = vpack.c.bf16 %v88_v15, %v80_v14  ;;  %v96_v25 = vld [vmem:[#allocation2 + $0x220] sm:$0xff]  ;;  %v1900_v7 = vand.u32 127, %v2635_v6 }
  0x35   :  { %1658 = vmatpush1.bf16.msra.mxu1 %v1657_v38  ;;  %1660 = vmatprep.subr.bf16.mxu0 %v1659_v39  ;;  %v107_v22 = vld [vmem:[#allocation2 + $0x278] sm:$0xff]  ;;  %v1675_v24 = vpack.c.bf16 %v105_v20, %v97_v19  ;;  %v104_v26 = vld [vmem:[#allocation2 + $0x260] sm:$0xff]  ;;  %v98_v27 = vld [vmem:[#allocation2 + $0x230] sm:$0xff] }
  0x36   :  { %1692 = vmatprep.subr.bf16.mxu1 %v1691_v43  ;;  %v1707_v28 = vpack.c.bf16 %v107_v22, %v99_v21  ;;  %v106_v29 = vld [vmem:[#allocation2 + $0x270] sm:$0xff]  ;;  %v113_v30 = vld [vmem:[#allocation2 + $0x2a8] sm:$0xff]  ;;  %v115_v32 = vld [vmem:[#allocation2 + $0x2b8] sm:$0xff]  ;;  %v1677_v34 = vpack.c.bf16 %v104_v26, %v96_v25  ;;  %v159_v8 = vadd.s32 256, %v1900_v7  ;;  %v169_v9 = vand.u32 7, %v1900_v7 }
  0x37   :  { %438 = vmatmul.mubr.f32.vlgmr.msra.gmra.mrb[0].mxu0 %v1891_v47  ;;  %v121_v31 = vld [vmem:[#allocation2 + $0x2e8] sm:$0xff]  ;;  %v123_v33 = vld [vmem:[#allocation2 + $0x2f8] sm:$0xff]  ;;  %v1709_v35 = vpack.c.bf16 %v106_v29, %v98_v27  ;;  %v112_v37 = vld [vmem:[#allocation2 + $0x2a0] sm:$0xff] }
  0x38   :  { %509 = vmatmul.mubr.f32.vlgmr.msra.gmra.mrb[0].mxu1 %v1891_v47  ;;  %1662 = vmatpush1.bf16.msra.mxu0 %v1661_v50  ;;  %v1679_v36 = vpack.c.bf16 %v121_v31, %v113_v30  ;;  %v120_v38 = vld [vmem:[#allocation2 + $0x2e0] sm:$0xff]  ;;  %v114_v39 = vld [vmem:[#allocation2 + $0x2b0] sm:$0xff]  ;;  %v1711_v40 = vpack.c.bf16 %v123_v33, %v115_v32  ;;  %v129_v42 = vld [vmem:[#allocation2 + $0x328] sm:$0xff]  ;;  %v183_v10 = vand.u32 7, %v159_v8 }
  0x39   :  { %1694 = vmatpush1.bf16.msra.mxu1 %v1693_v51  ;;  %1664 = vmatprep.subr.bf16.mxu0 %v1663_v52  ;;  %v122_v41 = vld [vmem:[#allocation2 + $0x2f0] sm:$0xff]  ;;  %v137_v43 = vld [vmem:[#allocation2 + $0x368] sm:$0xff]  ;;  %v131_v44 = vld [vmem:[#allocation2 + $0x338] sm:$0xff]  ;;  %v1681_v46 = vpack.c.bf16 %v120_v38, %v112_v37  ;;  %v160_v37 = vadd.s32 384, %v1900_v7 }
  0x3a   :  { %1696 = vmatprep.subr.bf16.mxu1 %v1695_v56  ;;  %579 = vmatprep.mubr.f32.mxu0 %v1850_v0  ;;  %v139_v45 = vld [vmem:[#allocation2 + $0x378] sm:$0xff]  ;;  %v1713_v48 = vpack.c.bf16 %v122_v41, %v114_v39  ;;  %v1683_v49 = vpack.c.bf16 %v137_v43, %v129_v42  ;;  %v128_v50 = vld [vmem:[#allocation2 + $0x320] sm:$0xff]  ;;  %v130_v52 = vld [vmem:[#allocation2 + $0x330] sm:$0xff] }
  0x3b   :  { %650 = vmatprep.mubr.f32.mxu1 %v1850_v0  ;;  %v1705_v0 = vpack.c.bf16 %v90_v18, %v82_v16  ;;  %v136_v51 = vld [vmem:[#allocation2 + $0x360] sm:$0xff]  ;;  %v1715_v53 = vpack.c.bf16 %v139_v45, %v131_v44  ;;  %v138_v54 = vld [vmem:[#allocation2 + $0x370] sm:$0xff]  ;;  %v145_v55 = vld [vmem:[#allocation2 + $0x3a8] sm:$0xff]  ;;  %v190_v44 = vand.u32 7, %v160_v37 }
  0x3c   :  { %1666 = vmatpush1.bf16.msra.mxu0 %v1665_v62  ;;  %v153_v56 = vld [vmem:[#allocation2 + $0x3e8] sm:$0xff]  ;;  %v147_v57 = vld [vmem:[#allocation2 + $0x3b8] sm:$0xff]  ;;  %v1685_v59 = vpack.c.bf16 %v136_v51, %v128_v50  ;;  %v1717_v60 = vpack.c.bf16 %v138_v54, %v130_v52  ;;  %v144_v62 = vld [vmem:[#allocation2 + $0x3a0] sm:$0xff]  ;;  %v1853_v52 = vmov 2131351028  }
  0x3d   :  { %1698 = vmatpush1.bf16.msra.mxu1 %v1697_v63  ;;  %1668 = vmatprep.subr.bf16.mxu0 %v1667_v1  ;;  %v155_v58 = vld [vmem:[#allocation2 + $0x3f8] sm:$0xff]  ;;  %v1687_v61 = vpack.c.bf16 %v153_v56, %v145_v55  ;;  %v152_v63 = vld [vmem:[#allocation2 + $0x3e0] sm:$0xff]  ;;  %v146_v2 = vld [vmem:[#allocation2 + $0x3b0] sm:$0xff]  ;;  %v1854_v55 = vmov 2102212464  }
  0x3e   :  { %1700 = vmatprep.subr.bf16.mxu1 %v1699_v5  ;;  %v1719_v1 = vpack.c.bf16 %v155_v58, %v147_v57  ;;  %v154_v3 = vld [vmem:[#allocation2 + $0x3f0] sm:$0xff]  ;;  %v1689_v4 = vpack.c.bf16 %v152_v63, %v144_v62  ;;  %v1855_v58 = vmov 920167782  }
  0x3f   :  { %v1721_v5 = vpack.c.bf16 %v154_v3, %v146_v2 }
  0x40   :  { %1670 = vmatpush1.bf16.msra.mxu0 %v1669_v11  ;;  %v158_v11 = vadd.s32 128, %v1900_v7 }
  0x41   :  { %1702 = vmatpush1.bf16.msra.mxu1 %v1701_v12  ;;  %1672 = vmatprep.subr.bf16.mxu0 %v1671_v13  ;;  %v265_v12 = vand.u32 1, %v169_v9  ;;  %v279_v13 = vand.u32 1, %v183_v10 }
  0x42   :  { %1704 = vmatprep.subr.bf16.mxu1 %v1703_v17  ;;  %v176_v14 = vand.u32 7, %v158_v11 }
  0x43   :  { %v357_v15 = vcvt.s32.f32 %v265_v12  ;;  %v359_v16 = vcvt.s32.f32 %v279_v13 }
  0x44   :  { %1674 = vmatpush1.bf16.msra.mxu0 %v1673_v23  ;;  %v272_v17 = vand.u32 1, %v176_v14 }
  0x45   :  { %1706 = vmatpush1.bf16.msra.mxu1 %v1705_v0  ;;  %1676 = vmatprep.subr.bf16.mxu0 %v1675_v24  ;;  %v365_v18 = vmul.f32 1.5707964, %v357_v15  ;;  %v367_v19 = vmul.f32 1.5707964, %v359_v16 }
  0x46   :  { %1708 = vmatprep.subr.bf16.mxu1 %v1707_v28 }
  0x48   :  { %1678 = vmatpush1.bf16.msra.mxu0 %v1677_v34 }
  0x49   :  { %1710 = vmatpush1.bf16.msra.mxu1 %v1709_v35  ;;  %1680 = vmatprep.subr.bf16.mxu0 %v1679_v36 }
  0x4a   :  { %1712 = vmatprep.subr.bf16.mxu1 %v1711_v40 }
  0x4c   :  { %1682 = vmatpush1.bf16.msra.mxu0 %v1681_v46  ;;  %v1851_v46 = vmov 683565275  }
  0x4d   :  { %1714 = vmatpush1.bf16.msra.mxu1 %v1713_v48  ;;  %1684 = vmatprep.subr.bf16.mxu0 %v1683_v49  ;;  %v1852_v49 = vmov 2475754826  }
  0x4e   :  { %1716 = vmatprep.subr.bf16.mxu1 %v1715_v53 }
  0x50   :  { %1686 = vmatpush1.bf16.msra.mxu0 %v1685_v59 }
  0x51   :  { %1718 = vmatpush1.bf16.msra.mxu1 %v1717_v60  ;;  %1688 = vmatprep.subr.bf16.mxu0 %v1687_v61  ;;  %v2642_v61 = vmov 1326507024  }
  0x52   :  { %1720 = vmatprep.subr.bf16.mxu1 %v1719_v1 }
  0x54   :  { %1690 = vmatpush1.bf16.msra.mxu0 %v1689_v4 }
  0x55   :  { %1722 = vmatpush1.bf16.msra.mxu1 %v1721_v5 }
  0x57   :  { %580 = vmatmul.mubr.f32.vlgmr.msra.gmra.mrb[2].mxu0 %v1891_v47 }
  0x58   :  { %651 = vmatmul.mubr.f32.vlgmr.msra.gmra.mrb[2].mxu1 %v1891_v47  ;;  %v358_v47 = vcvt.s32.f32 %v272_v17 }
  0x5a   :  { %v366_v26 = vmul.f32 1.5707964, %v358_v47 }
 0x10a   :  { %v439_v20 = vpop.f32.mrb[0].mxu0 }
 0x10b   :  { %v1905_v21 = vadd.f32 %v439_v20, %v365_v18  ;;  %v510_v22 = vpop.f32.mrb[0].mxu1  ;;  %v441_v23 = vpop.f32.mrb[1].mxu0 }
 0x10c   :  { %v1907_v0 = vadd.f32 %v510_v22, %v367_v19  ;;  %v1909_v24 = vpop.f32.mrb[1].mxu1  ;;  %v1914_v32 = vadd.f32 %v441_v23, %v366_v26 }
 0x10d   :  { %v660_v25 = vand.u32 2139095040, %v1905_v21  ;;  %v657_v30 = vand.u32 2147483647, %v1905_v21 }
 0x10e   :  { %v868_v27 = vand.u32 2139095040, %v1907_v0  ;;  %v764_v36 = vand.u32 2139095040, %v1914_v32 }
 0x10f   :  { %v661_v28 = vshrl.u32 %v660_v25, 23  ;;  %v664_v35 = vand.u32 8388607, %v657_v30 }
 0x110   :  { %v869_v29 = vshrl.u32 %v868_v27, 23  ;;  %v765_v43 = vshrl.u32 %v764_v36, 23 }
 0x111   :  { %v1563_v31 = vadd.s32 4294967169, %v661_v28  ;;  %v665_v41 = vor.u32 8388608, %v664_v35 }
 0x112   :  { %v1571_v33 = vadd.s32 4294967169, %v869_v29  ;;  %v1567_v29 = vadd.s32 4294967169, %v765_v43 }
 0x113   :  { %v667_v34 = vadd.s32 1, %v1563_v31  ;;  %v705_v11 = vshll.u32 %v665_v41, 8  ;;  %v286_v31 = vand.u32 1, %v190_v44 }
 0x114   :  { %v875_v39 = vadd.s32 1, %v1571_v33  ;;  %v771_v37 = vadd.s32 1, %v1567_v29 }
 0x115   :  { %vm668_vm0 = vcmp.gt.s32.totalorder %v667_v34, 0 }
 0x116   :  { %v669_v38 = vsel %vm668_vm0, %v667_v34, 0  ;;  %vm876_vm1 = vcmp.gt.s32.totalorder %v875_v39, 0  ;;  %vm772_vm7 = vcmp.gt.s32.totalorder %v771_v37, 0 }
 0x117   :  { %v671_v40 = vand.u32 31, %v669_v38  ;;  %v670_v45 = vshrl.u32 %v669_v38, 5  ;;  %v877_v3 = vsel %vm876_vm1, %v875_v39, 0  ;;  %v360_v38 = vcvt.s32.f32 %v286_v31 }
 0x118   :  { %v879_v17 = vand.u32 31, %v877_v3  ;;  %v1948_v43 = vshrl.u32 %v877_v3, 5 }
 0x119   :  { %v672_v42 = vsub.s32 32, %v671_v40  ;;  %v674_v48 = vshll.u32 %v1851_v46, %v671_v40  ;;  %v677_v50 = vshll.u32 %v1852_v49, %v671_v40  ;;  %v680_v54 = vshll.u32 %v1853_v52, %v671_v40 }
 0x11a   :  { %v683_v57 = vshll.u32 %v1854_v55, %v671_v40  ;;  %v686_v60 = vshll.u32 %v1855_v58, %v671_v40  ;;  %vm689_vm2 = vcmp.lt.s32.totalorder %v670_v45, 1  ;;  %vm692_vm3 = vcmp.lt.s32.totalorder %v670_v45, 4 }
 0x11b   :  { %v675_v51 = vshrl.u32 %v1852_v49, %v672_v42  ;;  %v678_v53 = vshrl.u32 %v1853_v52, %v672_v42  ;;  %v681_v56 = vshrl.u32 %v1854_v55, %v672_v42  ;;  %v684_v59 = vshrl.u32 %v1855_v58, %v672_v42 }
 0x11c   :  { %v687_v62 = vshrl.u32 %v2642_v61, %v672_v42  ;;  %v673_v12 = vshrl.u32 %v1851_v46, %v672_v42  ;;  %vm691_vm4 = vcmp.lt.s32.totalorder %v670_v45, 3  ;;  %vm690_vm5 = vcmp.lt.s32.totalorder %v670_v45, 2 }
 0x11d   :  { %v676_v63 = vor.u32 %v675_v51, %v674_v48  ;;  %v679_v1 = vor.u32 %v678_v53, %v677_v50  ;;  %v682_v2 = vor.u32 %v681_v56, %v680_v54  ;;  %v685_v4 = vor.u32 %v684_v59, %v683_v57 }
 0x11e   :  { %v688_v5 = vor.u32 %v687_v62, %v686_v60  ;;  %v880_v28 = vsub.s32 32, %v879_v17  ;;  %v2641_v42 = vand.u32 2147483647, %v1907_v0  ;;  %v891_v45 = vshll.u32 %v1854_v55, %v879_v17 }
 0x11f   :  { %v694_v8 = vsel %vm692_vm3, %v682_v2, 2102212464  ;;  %v697_v9 = vsel %vm689_vm2, %v676_v63, %v679_v1  ;;  %v701_v10 = vsel %vm689_vm2, %v679_v1, %v682_v2  ;;  %v698_v13 = vsel %vm692_vm3, %v685_v4, 920167782 }
 0x120   :  { %v702_v14 = vsel %vm692_vm3, %v688_v5, 1326507024  ;;  %v699_v15 = vsel %vm691_vm4, %v682_v2, %v698_v13  ;;  %v693_v18 = vsel %vm689_vm2, %v673_v12, %v676_v63  ;;  %v695_v19 = vsel %vm691_vm4, %v679_v1, %v694_v8 }
 0x121   :  { %v703_v16 = vsel %vm691_vm4, %v685_v4, %v702_v14  ;;  %v700_v47 = vsel %vm690_vm5, %v697_v9, %v699_v15  ;;  %v696_v27 = vsel %vm690_vm5, %v693_v18, %v695_v19  ;;  %v892_v36 = vshrl.u32 %v1855_v58, %v880_v28 }
 0x122   :  { %v704_v20 = vsel %vm690_vm5, %v701_v10, %v703_v16  ;;  %v1935_v25 = vmul.u32.u64.low %v705_v11, %v700_v47  ;;  %v1936_v26 = vmul.u32.u64.high %v705_v11, %v700_v47, %v1935_v25  ;;  %v712_v34 = vmul.u32 %v705_v11, %v696_v27 }
 0x123   :  { %v1932_v22 = vmul.u32.u64.low %v705_v11, %v704_v20  ;;  %v1933_v23 = vmul.u32.u64.high %v705_v11, %v704_v20, %v1932_v22  ;;  %v895_v40 = vshrl.u32 %v2642_v61, %v880_v28  ;;  %v883_v44 = vshrl.u32 %v1852_v49, %v880_v28 }
 0x124   :  { %v715_v33 = vadd.s32 1, %v1936_v26  ;;  %v886_v53 = vshrl.u32 %v1853_v52, %v880_v28  ;;  %v889_v54 = vshrl.u32 %v1854_v55, %v880_v28  ;;  %v894_v56 = vshll.u32 %v1855_v58, %v879_v17 }
 0x125   :  { %vm714_vm6 = vc.u32 %v1933_v23, %v1935_v25  ;;  %v882_v59 = vshll.u32 %v1851_v46, %v879_v17  ;;  %v893_v60 = vor.u32 %v892_v36, %v891_v45  ;;  %v368_v62 = vmul.f32 1.5707964, %v360_v38 }
 0x126   :  { %v716_v35 = vsel %vm714_vm6, %v715_v33, %v1936_v26  ;;  %v885_v1 = vshll.u32 %v1852_v49, %v879_v17  ;;  %v888_v2 = vshll.u32 %v1853_v52, %v879_v17  ;;  %v896_v3 = vor.u32 %v895_v40, %v894_v56 }
 0x127   :  { %v717_v39 = vadd.s32 %v716_v35, %v712_v34  ;;  %v872_v4 = vand.u32 8388607, %v2641_v42  ;;  %v884_v5 = vor.u32 %v883_v44, %v882_v59  ;;  %vm900_vm8 = vcmp.lt.s32.totalorder %v1948_v43, 4 }
 0x128   :  { %v887_v9 = vor.u32 %v886_v53, %v885_v1  ;;  %v890_v10 = vor.u32 %v889_v54, %v888_v2  ;;  %v906_v11 = vsel %vm900_vm8, %v893_v60, 920167782  ;;  %v773_v12 = vsel %vm772_vm7, %v771_v37, 0 }
 0x129   :  { %v718_v51 = vadd.s32 536870912, %v717_v39  ;;  %v1973_v13 = vadd.f32 %v1909_v24, %v368_v62  ;;  %v910_v15 = vsel %vm900_vm8, %v896_v3, 1326507024  ;;  %v873_v16 = vor.u32 8388608, %v872_v4 }
 0x12a   :  { %v1945_v41 = vpop.f32.mrb[2].mxu0  ;;  %vm897_vm9 = vcmp.lt.s32.totalorder %v1948_v43, 1  ;;  %vm899_vm10 = vcmp.lt.s32.totalorder %v1948_v43, 3  ;;  %v775_v47 = vand.u32 31, %v773_v12  ;;  %vm898_vm11 = vcmp.lt.s32.totalorder %v1948_v43, 2 }
 0x12b   :  { %v1952_v48 = vpop.f32.mrb[2].mxu1  ;;  %v1954_v50 = vpop.f32.mrb[3].mxu0  ;;  %v1962_v63 = vshrl.u32 %v718_v51, 30  ;;  %v905_v18 = vsel %vm897_vm9, %v884_v5, %v887_v9  ;;  %v907_v19 = vsel %vm899_vm10, %v890_v10, %v906_v11  ;;  %v909_v24 = vsel %vm897_vm9, %v887_v9, %v890_v10 }
 0x12c   :  { %v1959_v57 = vpop.f32.mrb[3].mxu1  ;;  %v911_v20 = vsel %vm899_vm10, %v893_v60, %v910_v15  ;;  %v972_v22 = vand.u32 2139095040, %v1973_v13  ;;  %v902_v27 = vsel %vm900_vm8, %v890_v10, 2102212464  ;;  %v881_v29 = vshrl.u32 %v1851_v46, %v880_v28 }
 0x12d   :  { %v720_v8 = vshll.u32 %v1962_v63, 30  ;;  %v908_v31 = vsel %vm898_vm11, %v905_v18, %v907_v19  ;;  %v2639_v33 = vand.u32 2147483647, %v1914_v32  ;;  %v1996_v34 = vadd.s32 512, %v1900_v7 }
 0x12e   :  { %v912_v36 = vsel %vm898_vm11, %v909_v24, %v911_v20  ;;  %v2000_v37 = vshll.u32 %v873_v16, 8  ;;  %v2002_v38 = vsub.s32 32, %v775_v47  ;;  %v903_v28 = vsel %vm899_vm10, %v887_v9, %v902_v27 }
 0x12f   :  { %v721_v14 = vsub.s32 %v717_v39, %v720_v8  ;;  %v901_v39 = vsel %vm897_vm9, %v881_v29, %v884_v5  ;;  %v973_v40 = vshrl.u32 %v972_v22, 23  ;;  %v2013_v53 = vshrl.u32 %v773_v12, 5 }
 0x130   :  { %v2009_v45 = vmul.u32.u64.low %v2000_v37, %v908_v31  ;;  %v2010_v51 = vmul.u32.u64.high %v2000_v37, %v908_v31, %v2009_v45  ;;  %v2016_v54 = vmul.u32.u64.low %v2000_v37, %v912_v36  ;;  %v2017_v56 = vmul.u32.u64.high %v2000_v37, %v912_v36, %v2016_v54 }
 0x131   :  { %v723_v17 = vsub.s32 0, %v721_v14  ;;  %v197_v59 = vand.u32 7, %v1996_v34  ;;  %v713_v60 = vadd.s32 %v1935_v25, %v1933_v23  ;;  %v768_v62 = vand.u32 8388607, %v2639_v33 }
 0x132   :  { %v791_v1 = vshrl.u32 %v2642_v61, %v2002_v38  ;;  %v904_v3 = vsel %vm898_vm11, %v901_v39, %v903_v28  ;;  %v788_v4 = vshrl.u32 %v1855_v58, %v2002_v38  ;;  %v1575_v5 = vadd.s32 4294967169, %v973_v40 }
 0x133   :  { %v1564_v26 = vmin.u32 %v723_v17, %v721_v14  ;;  %v790_v10 = vshll.u32 %v1855_v58, %v775_v47  ;;  %vm796_vm13 = vcmp.lt.s32.totalorder %v2013_v53, 4  ;;  %v779_v23 = vshrl.u32 %v1852_v49, %v2002_v38 }
 0x134   :  { %v782_v25 = vshrl.u32 %v1853_v52, %v2002_v38  ;;  %v785_v43 = vshrl.u32 %v1854_v55, %v2002_v38  ;;  %v787_v11 = vshll.u32 %v1854_v55, %v775_v47  ;;  %v781_v18 = vshll.u32 %v1852_v49, %v775_v47 }
 0x135   :  { %v725_v35 = vclz %v1564_v26  ;;  %v792_v17 = vor.u32 %v791_v1, %v790_v10  ;;  %v784_v19 = vshll.u32 %v1853_v52, %v775_v47  ;;  %v979_v20 = vadd.s32 1, %v1575_v5 }
 0x136   :  { %v789_v24 = vor.u32 %v788_v4, %v787_v11  ;;  %v923_v27 = vadd.s32 1, %v2010_v51  ;;  %v778_v29 = vshll.u32 %v1851_v46, %v775_v47  ;;  %vm922_vm14 = vc.u32 %v2017_v56, %v2009_v45 }
 0x137   :  { %v1565_v44 = vadd.s32 4294967294, %v725_v35  ;;  %v2045_v31 = vor.u32 %v782_v25, %v781_v18  ;;  %vm980_vm15 = vcmp.gt.s32.totalorder %v979_v20, 0  ;;  %v806_v36 = vsel %vm796_vm13, %v792_v17, 1326507024 }
 0x138   :  { %v2047_v35 = vor.u32 %v779_v23, %v778_v29  ;;  %v981_v39 = vsel %vm980_vm15, %v979_v20, 0  ;;  %vm793_vm0 = vcmp.lt.s32.totalorder %v2013_v53, 1  ;;  %vm795_vm1 = vcmp.lt.s32.totalorder %v2013_v53, 3 }
 0x139   :  { %vm1566_vm12 = vcmp.lt.s32.totalorder %v1565_v44, 0  ;;  %v802_v47 = vsel %vm796_vm13, %v789_v24, 920167782  ;;  %v163_v28 = vadd.s32 768, %v1900_v7  ;;  %v924_v54 = vsel %vm922_vm14, %v923_v27, %v2010_v51 }
 0x13a   :  { %v728_v2 = vsel %vm1566_vm12, 0, %v1565_v44  ;;  %v920_v1 = vmul.u32 %v2000_v37, %v904_v3  ;;  %v807_v5 = vsel %vm795_vm1, %v789_v24, %v806_v36  ;;  %v293_v10 = vand.u32 1, %v197_v59 }
 0x13b   :  { %v729_v8 = vsub.s32 32, %v728_v2  ;;  %v733_v9 = vsub.s32 4294967266, %v728_v2  ;;  %v730_v12 = vshll.u32 %v721_v14, %v728_v2  ;;  %v786_v14 = vor.u32 %v785_v43, %v784_v19 }
 0x13c   :  { %v769_v2 = vor.u32 8388608, %v768_v62  ;;  %v925_v23 = vadd.s32 %v924_v54, %v920_v1  ;;  %vm794_vm2 = vcmp.lt.s32.totalorder %v2013_v53, 2  ;;  %vm659_vm3 = vcmp.lt.s32.totalorder %v1905_v21, 0 }
 0x13d   :  { %v731_v15 = vshrl.u32 %v713_v60, %v729_v8  ;;  %v734_v16 = vadd.s32 127, %v733_v9  ;;  %v983_v60 = vand.u32 31, %v981_v39  ;;  %v805_v4 = vsel %vm793_vm0, %v2045_v31, %v786_v14 }
 0x13e   :  { %v801_v9 = vsel %vm793_vm0, %v2047_v35, %v2045_v31  ;;  %v803_v51 = vsel %vm795_vm1, %v786_v14, %v802_v47  ;;  %v808_v62 = vsel %vm794_vm2, %v805_v4, %v807_v5  ;;  %v2077_v43 = vshll.u32 %v769_v2, 8 }
 0x13f   :  { %v732_v22 = vor.u32 %v731_v15, %v730_v12  ;;  %v735_v26 = vshll.u32 %v734_v16, 23  ;;  %v2072_v3 = vsub.s32 32, %v983_v60  ;;  %v804_v25 = vsel %vm794_vm2, %v801_v9, %v803_v51 }
 0x140   :  { %v211_v11 = vand.u32 7, %v163_v28  ;;  %vm2081_vm4 = vcmp.le.f32.partialorder %v657_v30, 0.7853982  ;;  %v2638_v15 = vand.u32 2147483647, %v1973_v13  ;;  %v361_v16 = vcvt.s32.f32 %v293_v10 }
 0x141   :  { %v736_v34 = vor.u32 4788187, %v735_v26  ;;  %v739_v44 = vcvt.s32.f32 %v732_v22  ;;  %v926_v18 = vadd.s32 536870912, %v925_v23  ;;  %v995_v22 = vshll.u32 %v1854_v55, %v983_v60 }
 0x142   :  { %v2094_v19 = vmul.u32.u64.low %v2077_v43, %v808_v62  ;;  %v2095_v24 = vmul.u32.u64.high %v2077_v43, %v808_v62, %v2094_v19  ;;  %v2098_v30 = vmul.u32.u64.low %v2077_v43, %v804_v25  ;;  %v2099_v20 = vmul.u32.u64.high %v2077_v43, %v804_v25, %v2098_v30 }
 0x143   :  { %v737_v40 = vand.u32 2147483647, %v736_v34  ;;  %v996_v26 = vshrl.u32 %v1855_v58, %v2072_v3  ;;  %v2105_v27 = vshrl.u32 %v981_v39, 5  ;;  %v987_v29 = vshrl.u32 %v1852_v49, %v2072_v3 }
 0x144   :  { %v990_v34 = vshrl.u32 %v1853_v52, %v2072_v3  ;;  %v993_v36 = vshrl.u32 %v1854_v55, %v2072_v3  ;;  %v998_v28 = vshll.u32 %v1855_v58, %v983_v60  ;;  %v2116_v54 = vshrl.u32 %v926_v18, 30 }
 0x145   :  { %v740_v8 = vmul.f32 %v739_v44, %v737_v40  ;;  %v997_v47 = vor.u32 %v996_v26, %v995_v22  ;;  %v999_v40 = vshrl.u32 %v2642_v61, %v2072_v3  ;;  %v307_v44 = vand.u32 1, %v211_v11 }
 0x146   :  { %v986_v39 = vshll.u32 %v1851_v46, %v983_v60  ;;  %v989_v1 = vshll.u32 %v1852_v49, %v983_v60  ;;  %v992_v2 = vshll.u32 %v1853_v52, %v983_v60  ;;  %v777_v4 = vshrl.u32 %v1851_v46, %v2002_v38 }
 0x147   :  { %v741_v37 = vxor.u32 2147483648, %v740_v8  ;;  %v976_v5 = vand.u32 8388607, %v2638_v15  ;;  %v369_v9 = vmul.f32 1.5707964, %v361_v16  ;;  %vm1004_vm5 = vcmp.lt.s32.totalorder %v2105_v27, 4 }
 0x148   :  { %v988_v51 = vor.u32 %v987_v29, %v986_v39  ;;  %v991_v10 = vor.u32 %v990_v34, %v989_v1  ;;  %v798_v62 = vsel %vm796_vm13, %v786_v14, 2102212464  ;;  %v1010_v25 = vsel %vm1004_vm5, %v997_v47, 920167782 }
 0x149   :  { %v742_v12 = vsel %vm659_vm3, %v741_v37, %v740_v8  ;;  %v1000_v8 = vor.u32 %v999_v40, %v998_v28  ;;  %v994_v37 = vor.u32 %v993_v36, %v992_v2  ;;  %v928_v60 = vshll.u32 %v2116_v54, 30 }
 0x14a   :  { %v2091_v17 = vsel %vm2081_vm4, %v1905_v21, %v742_v12  ;;  %v797_v38 = vsel %vm793_vm0, %v777_v4, %v2047_v35  ;;  %v363_v11 = vcvt.s32.f32 %v307_v44  ;;  %vm1001_vm6 = vcmp.lt.s32.totalorder %v2105_v27, 1 }
 0x14b   :  { %vm1003_vm7 = vcmp.lt.s32.totalorder %v2105_v27, 3  ;;  %v1014_v12 = vsel %vm1004_vm5, %v1000_v8, 1326507024  ;;  %v2139_v16 = vadd.f32 %v1945_v41, %v369_v9  ;;  %v799_v14 = vsel %vm795_vm1, %v2045_v31, %v798_v62 }
 0x14c   :  { %v977_v18 = vor.u32 8388608, %v976_v5  ;;  %v1009_v19 = vsel %vm1001_vm6, %v988_v51, %v991_v10  ;;  %v1011_v35 = vsel %vm1003_vm7, %v994_v37, %v1010_v25  ;;  %v819_v22 = vadd.s32 1, %v2099_v20 }
 0x14d   :  { %v1013_v26 = vsel %vm1001_vm6, %v991_v10, %v994_v37  ;;  %v1015_v41 = vsel %vm1003_vm7, %v997_v47, %v1014_v12  ;;  %vm818_vm8 = vc.u32 %v2095_v24, %v2098_v30  ;;  %vm1002_vm9 = vcmp.lt.s32.totalorder %v2105_v27, 2 }
 0x14e   :  { %v162_v31 = vadd.s32 640, %v1900_v7  ;;  %v2157_v29 = vsub.s32 %v925_v23, %v928_v60  ;;  %v800_v34 = vsel %vm794_vm2, %v797_v38, %v799_v14  ;;  %v1012_v36 = vsel %vm1002_vm9, %v1009_v19, %v1011_v35 }
 0x14f   :  { %v1076_v28 = vand.u32 2139095040, %v2139_v16  ;;  %v1016_v47 = vsel %vm1002_vm9, %v1013_v26, %v1015_v41  ;;  %v1017_v40 = vshll.u32 %v977_v18, 8  ;;  %v371_v44 = vmul.f32 1.5707964, %v363_v11 }
 0x150   :  { %v820_v39 = vsel %vm818_vm8, %v819_v22, %v2099_v20  ;;  %v816_v2 = vmul.u32 %v2077_v43, %v800_v34  ;;  %v204_v53 = vand.u32 7, %v162_v31  ;;  %v931_v5 = vsub.s32 0, %v2157_v29 }
 0x151   :  { %v1077_v1 = vshrl.u32 %v1076_v28, 23  ;;  %v2168_v23 = vmul.u32.u64.low %v1017_v40, %v1012_v36  ;;  %v2169_v4 = vmul.u32.u64.high %v1017_v40, %v1012_v36, %v2168_v23  ;;  %v2637_v60 = vand.u32 2147483647, %v2139_v16 }
 0x152   :  { %v2173_v8 = vmul.u32.u64.low %v1017_v40, %v1016_v47  ;;  %v2174_v9 = vmul.u32.u64.high %v1017_v40, %v1016_v47, %v2173_v8  ;;  %v2176_v25 = vadd.s32 %v820_v39, %v816_v2  ;;  %v2180_v20 = vadd.f32 %v1952_v48, %v371_v44 }
 0x153   :  { %v1579_v62 = vadd.s32 4294967169, %v1077_v1  ;;  %v1006_v43 = vsel %vm1004_vm5, %v994_v37, 2102212464  ;;  %v2184_v11 = vand.u32 1, %v204_v53  ;;  %v1572_v12 = vmin.u32 %v931_v5, %v2157_v29 }
 0x154   :  { %v985_v14 = vshrl.u32 %v1851_v46, %v2072_v3  ;;  %v822_v18 = vadd.s32 536870912, %v2176_v25  ;;  %v1080_v19 = vand.u32 8388607, %v2637_v60  ;;  %v1284_v48 = vand.u32 2139095040, %v2180_v20 }
 0x155   :  { %v1083_v38 = vadd.s32 1, %v1579_v62  ;;  %v1007_v37 = vsel %vm1003_vm7, %v991_v10, %v1006_v43  ;;  %v1027_v41 = vadd.s32 1, %v2169_v4  ;;  %v362_v3 = vcvt.s32.f32 %v2184_v11 }
 0x156   :  { %v1005_v22 = vsel %vm1001_vm6, %v985_v14, %v988_v51  ;;  %v933_v31 = vclz %v1572_v12  ;;  %vm1026_vm11 = vc.u32 %v2174_v9, %v2168_v23  ;;  %v164_v36 = vadd.s32 896, %v1900_v7 }
 0x157   :  { %vm1084_vm10 = vcmp.gt.s32.totalorder %v1083_v38, 0  ;;  %v2202_v28 = vshrl.u32 %v822_v18, 30  ;;  %v1008_v51 = vsel %vm1002_vm9, %v1005_v22, %v1007_v37  ;;  %v1081_v47 = vor.u32 8388608, %v1080_v19 }
 0x158   :  { %v1085_v35 = vsel %vm1084_vm10, %v1083_v38, 0  ;;  %v1285_v44 = vshrl.u32 %v1284_v48, 23  ;;  %v1028_v53 = vsel %vm1026_vm11, %v1027_v41, %v2169_v4  ;;  %v1573_v12 = vadd.s32 4294967294, %v933_v31 }
 0x159   :  { %v1087_v26 = vand.u32 31, %v1085_v35  ;;  %v1086_v5 = vshrl.u32 %v1085_v35, 5  ;;  %v1024_v14 = vmul.u32 %v1017_v40, %v1008_v51  ;;  %v218_v19 = vand.u32 7, %v164_v36 }
 0x15a   :  { %v1587_v35 = vadd.s32 4294967169, %v1285_v44  ;;  %v824_v37 = vshll.u32 %v2202_v28, 30  ;;  %vm1574_vm0 = vcmp.lt.s32.totalorder %v1573_v12, 0  ;;  %1767 = vcosq.f32 %v2091_v17 }
 0x15b   :  { %v1088_v34 = vsub.s32 32, %v1087_v26  ;;  %v1090_v10 = vshll.u32 %v1851_v46, %v1087_v26  ;;  %v1093_v1 = vshll.u32 %v1852_v49, %v1087_v26  ;;  %v1096_v7 = vshll.u32 %v1853_v52, %v1087_v26 }
 0x15c   :  { %v1099_v38 = vshll.u32 %v1854_v55, %v1087_v26  ;;  %v1102_v22 = vshll.u32 %v1855_v58, %v1087_v26  ;;  %v2218_v41 = vadd.s32 %v1028_v53, %v1024_v14  ;;  %vm1105_vm12 = vcmp.lt.s32.totalorder %v1086_v5, 1 }
 0x15d   :  { %v1091_v39 = vshrl.u32 %v1852_v49, %v1088_v34  ;;  %v1094_v2 = vshrl.u32 %v1853_v52, %v1088_v34  ;;  %v1097_v8 = vshrl.u32 %v1854_v55, %v1088_v34  ;;  %v1100_v43 = vshrl.u32 %v1855_v58, %v1088_v34 }
 0x15e   :  { %v1103_v4 = vshrl.u32 %v2642_v61, %v1088_v34  ;;  %vm1108_vm13 = vcmp.lt.s32.totalorder %v1086_v5, 4  ;;  %vm1107_vm14 = vcmp.lt.s32.totalorder %v1086_v5, 3  ;;  %vm1106_vm15 = vcmp.lt.s32.totalorder %v1086_v5, 2 }
 0x15f   :  { %v1092_v62 = vor.u32 %v1091_v39, %v1090_v10  ;;  %v1095_v27 = vor.u32 %v1094_v2, %v1093_v1  ;;  %v1098_v18 = vor.u32 %v1097_v8, %v1096_v7  ;;  %v1101_v48 = vor.u32 %v1100_v43, %v1099_v38 }
 0x160   :  { %v1121_v10 = vshll.u32 %v1081_v47, 8  ;;  %v1089_v39 = vshrl.u32 %v1851_v46, %v1088_v34  ;;  %v1104_v1 = vor.u32 %v1103_v4, %v1102_v22  ;;  %v1291_v7 = vadd.s32 1, %v1587_v35 }
 0x161   :  { %v1113_v31 = vsel %vm1105_vm12, %v1092_v62, %v1095_v27  ;;  %v1110_v40 = vsel %vm1108_vm13, %v1098_v18, 2102212464  ;;  %v1114_v36 = vsel %vm1108_vm13, %v1101_v48, 920167782  ;;  %v1117_v51 = vsel %vm1105_vm12, %v1095_v27, %v1098_v18 }
 0x162   :  { %v1115_v26 = vsel %vm1107_vm14, %v1098_v18, %v1114_v36  ;;  %v1118_v2 = vsel %vm1108_vm13, %v1104_v1, 1326507024  ;;  %v2222_v44 = vsub.s32 %v2176_v25, %v824_v37  ;;  %v1109_v53 = vsel %vm1105_vm12, %v1089_v39, %v1092_v62 }
 0x163   :  { %v1116_v8 = vsel %vm1106_vm15, %v1113_v31, %v1115_v26  ;;  %v1119_v47 = vsel %vm1107_vm14, %v1101_v48, %v1118_v2  ;;  %v1111_v38 = vsel %vm1107_vm14, %v1095_v27, %v1110_v40  ;;  %v1030_v22 = vadd.s32 536870912, %v2218_v41 }
 0x164   :  { %v1120_v34 = vsel %vm1106_vm15, %v1117_v51, %v1119_v47  ;;  %v2226_v43 = vmul.u32.u64.low %v1121_v10, %v1116_v8  ;;  %v2227_v14 = vmul.u32.u64.high %v1121_v10, %v1116_v8, %v2226_v43  ;;  %v2231_v18 = vand.u32 1, %v218_v19 }
 0x165   :  { %v743_v4 = vsub.s32 4, %v1962_v63  ;;  %v2234_v25 = vmul.u32.u64.low %v1121_v10, %v1120_v34  ;;  %v2235_v35 = vmul.u32.u64.high %v1121_v10, %v1120_v34, %v2234_v25  ;;  %vm1292_vm1 = vcmp.gt.s32.totalorder %v1291_v7, 0 }
 0x166   :  { %v827_v62 = vsub.s32 0, %v2222_v44  ;;  %v1112_v27 = vsel %vm1106_vm15, %v1109_v53, %v1111_v38  ;;  %v2636_v48 = vand.u32 2147483647, %v2180_v20  ;;  %v1293_v37 = vsel %vm1292_vm1, %v1291_v7, 0 }
 0x167   :  { %v2240_v39 = vsel %vm1574_vm0, 0, %v1573_v12  ;;  %v1131_v1 = vadd.s32 1, %v2227_v14  ;;  %v1295_v31 = vand.u32 31, %v1293_v37  ;;  %v370_v19 = vmul.f32 1.5707964, %v362_v3 }
 0x168   :  { %v921_v40 = vadd.s32 %v2009_v45, %v2017_v56  ;;  %v2247_v36 = vshrl.u32 %v1030_v22, 30  ;;  %v364_v51 = vcvt.s32.f32 %v2231_v18  ;;  %v744_v5 = vsel %vm659_vm3, %v743_v4, %v1962_v63 }
 0x169   :  { %v1128_v26 = vmul.u32 %v1121_v10, %v1112_v27  ;;  %vm1130_vm2 = vc.u32 %v2235_v35, %v2226_v43  ;;  %v1296_v12 = vsub.s32 32, %v1295_v31  ;;  %v937_v2 = vsub.s32 32, %v2240_v39 }
 0x16a   :  { %v1568_v11 = vmin.u32 %v827_v62, %v2222_v44  ;;  %v1132_v3 = vsel %vm1130_vm2, %v1131_v1, %v2227_v14  ;;  %v1288_v45 = vand.u32 8388607, %v2636_v48  ;;  %v2263_v63 = vadd.f32 %v1954_v50, %v370_v19 }
 0x16b   :  { %v1133_v56 = vadd.s32 %v1132_v3, %v1128_v26  ;;  %v1299_v7 = vshrl.u32 %v1852_v49, %v1296_v12  ;;  %v1302_v53 = vshrl.u32 %v1853_v52, %v1296_v12  ;;  %v1032_v10 = vshll.u32 %v2247_v36, 30 }
 0x16c   :  { %v1298_v8 = vshll.u32 %v1851_v46, %v1295_v31  ;;  %v1301_v47 = vshll.u32 %v1852_v49, %v1295_v31  ;;  %v1305_v38 = vshrl.u32 %v1854_v55, %v1296_v12  ;;  %v1294_v34 = vshrl.u32 %v1293_v37, 5 }
 0x16d   :  { %v1304_v14 = vshll.u32 %v1853_v52, %v1295_v31  ;;  %v1307_v22 = vshll.u32 %v1854_v55, %v1295_v31  ;;  %v1308_v4 = vshrl.u32 %v1855_v58, %v1296_v12  ;;  %v1134_v25 = vadd.s32 536870912, %v1133_v56 }
 0x16e   :  { %v1300_v62 = vor.u32 %v1299_v7, %v1298_v8  ;;  %v1303_v27 = vor.u32 %v1302_v53, %v1301_v47  ;;  %v1311_v50 = vshrl.u32 %v2642_v61, %v1296_v12  ;;  %v941_v1 = vsub.s32 4294967266, %v2240_v39 }
 0x16f   :  { %v829_v19 = vclz %v1568_v11  ;;  %v1309_v26 = vor.u32 %v1308_v4, %v1307_v22  ;;  %v1180_v3 = vand.u32 2139095040, %v2263_v63  ;;  %v746_v37 = vsel %vm2081_vm4, 0, %v744_v5 }
 0x170   :  { %v1289_v6 = vor.u32 8388608, %v1288_v45  ;;  %v1306_v48 = vor.u32 %v1305_v38, %v1304_v14  ;;  %v1310_v60 = vshll.u32 %v1855_v58, %v1295_v31  ;;  %v939_v15 = vshrl.u32 %v921_v40, %v937_v2 }
 0x171   :  { %v2279_v33 = vsub.s32 %v2218_v41, %v1032_v10  ;;  %vm1313_vm3 = vcmp.lt.s32.totalorder %v1294_v34, 1  ;;  %vm1316_vm5 = vcmp.lt.s32.totalorder %v1294_v34, 4  ;;  %v2281_v7 = vshrl.u32 %v1134_v25, 30 }
 0x172   :  { %v1312_v53 = vor.u32 %v1311_v50, %v1310_v60  ;;  %v1321_v11 = vsel %vm1313_vm3, %v1300_v62, %v1303_v27  ;;  %v1322_v8 = vsel %vm1316_vm5, %v1309_v26, 920167782  ;;  %v942_v47 = vadd.s32 127, %v941_v1 }
 0x173   :  { %v1569_v59 = vadd.s32 4294967294, %v829_v19  ;;  %vm1315_vm4 = vcmp.lt.s32.totalorder %v1294_v34, 3  ;;  %v1181_v5 = vshrl.u32 %v1180_v3, 23  ;;  %vm1314_vm6 = vcmp.lt.s32.totalorder %v1294_v34, 2 }
 0x174   :  { %v1318_v31 = vsel %vm1316_vm5, %v1306_v48, 2102212464  ;;  %v1323_v40 = vsel %vm1315_vm4, %v1306_v48, %v1322_v8  ;;  %v1329_v2 = vshll.u32 %v1289_v6, 8  ;;  %v1035_v41 = vsub.s32 0, %v2279_v33 }
 0x175   :  { %v1297_v45 = vshrl.u32 %v1851_v46, %v1296_v12  ;;  %v1324_v10 = vsel %vm1314_vm6, %v1321_v11, %v1323_v40  ;;  %v1325_v60 = vsel %vm1313_vm3, %v1303_v27, %v1306_v48  ;;  %v1136_v38 = vshll.u32 %v2281_v7, 30 }
 0x176   :  { %v1326_v14 = vsel %vm1316_vm5, %v1312_v53, 1326507024  ;;  %v2292_v22 = vmul.u32.u64.low %v1329_v2, %v1324_v10  ;;  %v2293_v4 = vmul.u32.u64.high %v1329_v2, %v1324_v10, %v2292_v22  ;;  %v1319_v50 = vsel %vm1315_vm4, %v1303_v27, %v1318_v31 }
 0x177   :  { %v1317_v25 = vsel %vm1313_vm3, %v1297_v45, %v1300_v62  ;;  %v1327_v6 = vsel %vm1315_vm4, %v1309_v26, %v1326_v14  ;;  %v1583_v1 = vadd.s32 4294967169, %v1181_v5  ;;  %v750_v19 = vadd.s32 3, %v746_v37 }
 0x178   :  { %v938_v12 = vshll.u32 %v2157_v29, %v2240_v39  ;;  %v943_v3 = vshll.u32 %v942_v47, 23  ;;  %v1328_v48 = vsel %vm1314_vm6, %v1325_v60, %v1327_v6  ;;  %vm1570_vm7 = vcmp.lt.s32.totalorder %v1569_v59, 0 }
 0x179   :  { %v2300_v11 = vmul.u32.u64.low %v1329_v2, %v1328_v48  ;;  %v2301_v8 = vmul.u32.u64.high %v1329_v2, %v1328_v48, %v2300_v11  ;;  %v1187_v53 = vadd.s32 1, %v1583_v1  ;;  %v1576_v40 = vmin.u32 %v1035_v41, %v2279_v33 }
 0x17a   :  { %v2304_v10 = vsub.s32 %v1133_v56, %v1136_v38  ;;  %v1320_v62 = vsel %vm1314_vm6, %v1317_v25, %v1319_v50  ;;  %v1339_v27 = vadd.s32 1, %v2293_v4  ;;  %v940_v26 = vor.u32 %v939_v15, %v938_v12 }
 0x17b   :  { %vm1188_vm8 = vcmp.gt.s32.totalorder %v1187_v53, 0  ;;  %v2308_v37 = vand.u32 3, %v750_v19  ;;  %v2640_v29 = vand.u32 2147483647, %v2263_v63  ;;  %v372_v47 = vmul.f32 1.5707964, %v364_v51 }
 0x17c   :  { %v1189_v39 = vsel %vm1188_vm8, %v1187_v53, 0  ;;  %v944_v5 = vor.u32 4788187, %v943_v3  ;;  %v2313_v31 = vsel %vm1570_vm7, 0, %v1569_v59  ;;  %v1336_v41 = vmul.u32 %v1329_v2, %v1320_v62 }
 0x17d   :  { %vm1338_vm9 = vc.u32 %v2301_v8, %v2292_v22  ;;  %v1037_v56 = vclz %v1576_v40  ;;  %v1139_v34 = vsub.s32 0, %v2304_v10  ;;  %v1191_v45 = vand.u32 31, %v1189_v39 }
 0x17e   :  { %v1340_v15 = vsel %vm1338_vm9, %v1339_v27, %v2293_v4  ;;  %v947_v60 = vcvt.s32.f32 %v940_v26  ;;  %v817_v18 = vadd.s32 %v2098_v30, %v2095_v24  ;;  %1769 = vsinq.f32 %v2091_v17 }
 0x17f   :  { %v1341_v51 = vadd.s32 %v1340_v15, %v1336_v41  ;;  %v1184_v59 = vand.u32 8388607, %v2640_v29  ;;  %v1192_v2 = vsub.s32 32, %v1191_v45  ;;  %v2326_v38 = vadd.f32 %v1959_v57, %v372_v47 }
 0x180   :  { %v945_v14 = vand.u32 2147483647, %v944_v5  ;;  %v833_v4 = vsub.s32 32, %v2313_v31  ;;  %v837_v25 = vsub.s32 4294967266, %v2313_v31  ;;  %v1577_v6 = vadd.s32 4294967294, %v1037_v56 }
 0x181   :  { %v1342_v50 = vadd.s32 536870912, %v1341_v51  ;;  %v1580_v1 = vmin.u32 %v1139_v34, %v2304_v10  ;;  %v1195_v24 = vshrl.u32 %v1852_v49, %v1192_v2  ;;  %v1198_v17 = vshrl.u32 %v1853_v52, %v1192_v2 }
 0x182   :  { %v1194_v19 = vshll.u32 %v1851_v46, %v1191_v45  ;;  %v1201_v57 = vshrl.u32 %v1854_v55, %v1192_v2  ;;  %v1204_v12 = vshrl.u32 %v1855_v58, %v1192_v2  ;;  %v1185_v3 = vor.u32 8388608, %v1184_v59 }
 0x183   :  { %v2333_v30 = vshrl.u32 %v1342_v50, 30  ;;  %v1197_v48 = vshll.u32 %v1852_v49, %v1191_v45  ;;  %v1203_v11 = vshll.u32 %v1854_v55, %v1191_v45  ;;  %v1388_v53 = vand.u32 2139095040, %v2326_v38 }
 0x184   :  { %v1190_v62 = vshrl.u32 %v1189_v39, 5  ;;  %v1196_v27 = vor.u32 %v1195_v24, %v1194_v19  ;;  %v1200_v26 = vshll.u32 %v1853_v52, %v1191_v45  ;;  %v1206_v41 = vshll.u32 %v1855_v58, %v1191_v45  ;;  %v1768_v19 = vpop.eup %1767 }
 0x185   :  { %v1344_v40 = vshll.u32 %v2333_v30, 30  ;;  %v1199_v47 = vor.u32 %v1198_v17, %v1197_v48  ;;  %v1205_v5 = vor.u32 %v1204_v12, %v1203_v11  ;;  %v1207_v56 = vshrl.u32 %v2642_v61, %v1192_v2 }
 0x186   :  { %v2345_v34 = vmul.f32 %v947_v60, %v945_v14  ;;  %v834_v15 = vshll.u32 %v2222_v44, %v2313_v31  ;;  %v1202_v50 = vor.u32 %v1201_v57, %v1200_v26  ;;  %v835_v29 = vshrl.u32 %v817_v18, %v833_v4 }
 0x187   :  { %v2349_v59 = vsub.s32 %v1341_v51, %v1344_v40  ;;  %v838_v42 = vadd.s32 127, %v837_v25  ;;  %v1208_v39 = vor.u32 %v1207_v56, %v1206_v41  ;;  %v1389_v24 = vshrl.u32 %v1388_v53, 23 }
 0x188   :  { %vm1578_vm10 = vcmp.lt.s32.totalorder %v1577_v6, 0  ;;  %vm1209_vm11 = vcmp.lt.s32.totalorder %v1190_v62, 1  ;;  %vm1212_vm12 = vcmp.lt.s32.totalorder %v1190_v62, 4  ;;  %v1770_v45 = vpop.eup %1769  ;;  %v1141_v12 = vclz %v1580_v1 }
 0x189   :  { %v1347_v17 = vsub.s32 0, %v2349_v59  ;;  %v1217_v60 = vsel %vm1209_vm11, %v1196_v27, %v1199_v47  ;;  %v1218_v14 = vsel %vm1212_vm12, %v1205_v5, 920167782  ;;  %v1225_v48 = vshll.u32 %v1185_v3, 8 }
 0x18a   :  { %v1193_v44 = vshrl.u32 %v1851_v46, %v1192_v2  ;;  %vm1211_vm13 = vcmp.lt.s32.totalorder %v1190_v62, 3  ;;  %v1214_v31 = vsel %vm1212_vm12, %v1202_v50, 2102212464  ;;  %v1221_v18 = vsel %vm1209_vm11, %v1199_v47, %v1202_v50 }
 0x18b   :  { %vm1210_vm14 = vcmp.lt.s32.totalorder %v1190_v62, 2  ;;  %v1219_v51 = vsel %vm1211_vm13, %v1202_v50, %v1218_v14  ;;  %v1222_v4 = vsel %vm1212_vm12, %v1208_v39, 1326507024  ;;  %v1591_v25 = vadd.s32 4294967169, %v1389_v24 }
 0x18c   :  { %v1588_v57 = vmin.u32 %v1347_v17, %v2349_v59  ;;  %v1213_v11 = vsel %vm1209_vm11, %v1193_v44, %v1196_v27  ;;  %v1220_v1 = vsel %vm1210_vm14, %v1217_v60, %v1219_v51  ;;  %v1223_v53 = vsel %vm1211_vm13, %v1205_v5, %v1222_v4 }
 0x18d   :  { %v1215_v40 = vsel %vm1211_vm13, %v1199_v47, %v1214_v31  ;;  %v1224_v3 = vsel %vm1210_vm14, %v1221_v18, %v1223_v53  ;;  %v2359_v26 = vmul.u32.u64.low %v1225_v48, %v1220_v1  ;;  %v2360_v2 = vmul.u32.u64.high %v1225_v48, %v1220_v1, %v2359_v26 }
 0x18e   :  { %v839_v41 = vshll.u32 %v838_v42, 23  ;;  %v1581_v56 = vadd.s32 4294967294, %v1141_v12  ;;  %v2363_v61 = vmul.u32.u64.low %v1225_v48, %v1224_v3  ;;  %v2364_v50 = vmul.u32.u64.high %v1225_v48, %v1224_v3, %v2363_v61 }
 0x18f   :  { %v2367_v39 = vsel %vm1578_vm10, 0, %v1577_v6  ;;  %v2643_v27 = vand.u32 2147483647, %v2326_v38  ;;  %v1395_v24 = vadd.s32 1, %v1591_v25  ;;  %v754_v17 = vxor.u32 2147483648, %v1770_v45 }
 0x190   :  { %v1349_v5 = vclz %v1588_v57  ;;  %v1216_v47 = vsel %vm1210_vm14, %v1213_v11, %v1215_v40  ;;  %vm753_vm15 = vcmp.eq.s32.totalorder %v2308_v37, 0  ;;  %v757_v60 = vxor.u32 2147483648, %v1768_v19 }
 0x191   :  { %v2372_v14 = vor.u32 %v835_v29, %v834_v15  ;;  %v1235_v42 = vadd.s32 1, %v2360_v2  ;;  %vm1396_vm0 = vcmp.gt.s32.totalorder %v1395_v24, 0  ;;  %v755_v12 = vsel %vm753_vm15, %v1768_v19, %v754_v17 }
 0x192   :  { %v2375_v61 = vor.u32 4788187, %v839_v41  ;;  %v1045_v6 = vsub.s32 4294967266, %v2367_v39  ;;  %vm1582_vm1 = vcmp.lt.s32.totalorder %v1581_v56, 0  ;;  %vm756_vm2 = vcmp.eq.s32.totalorder %v2308_v37, 2 }
 0x193   :  { %v1232_v44 = vmul.u32 %v1225_v48, %v1216_v47  ;;  %vm1234_vm3 = vc.u32 %v2364_v50, %v2359_v26  ;;  %v1397_v62 = vsel %vm1396_vm0, %v1395_v24, 0  ;;  %v758_v31 = vsel %vm756_vm2, %v757_v60, %v1770_v45 }
 0x194   :  { %v1589_v18 = vadd.s32 4294967294, %v1349_v5  ;;  %v1236_v29 = vsel %vm1234_vm3, %v1235_v42, %v2360_v2  ;;  %v1392_v15 = vand.u32 8388607, %v2643_v27  ;;  %vm752_vm5 = vcmp.lt.s32.totalorder %v2308_v37, 2 }
 0x195   :  { %v2385_v19 = vsel %vm1582_vm1, 0, %v1581_v56  ;;  %v1237_v51 = vadd.s32 %v1236_v29, %v1232_v44  ;;  %v1399_v4 = vand.u32 31, %v1397_v62  ;;  %v759_v25 = vsel %vm752_vm5, %v755_v12, %v758_v31 }
 0x196   :  { %v1025_v45 = vadd.s32 %v2168_v23, %v2174_v9  ;;  %v1041_v11 = vsub.s32 32, %v2367_v39  ;;  %v1046_v53 = vadd.s32 127, %v1045_v6  ;;  %v1149_v3 = vsub.s32 4294967266, %v2385_v19 }
 0x197   :  { %v1238_v40 = vadd.s32 536870912, %v1237_v51  ;;  %v1400_v37 = vsub.s32 32, %v1399_v4  ;;  %vm1590_vm4 = vcmp.lt.s32.totalorder %v1589_v18, 0  ;;  %v1393_v2 = vor.u32 8388608, %v1392_v15 }
 0x198   :  { %v1402_v41 = vshll.u32 %v1851_v46, %v1399_v4  ;;  %v1405_v23 = vshll.u32 %v1852_v49, %v1399_v4  ;;  %v1408_v17 = vshll.u32 %v1853_v52, %v1399_v4  ;;  %v1411_v47 = vshll.u32 %v1854_v55, %v1399_v4 }
 0x199   :  { %v2396_v56 = vshrl.u32 %v1238_v40, 30  ;;  %v1403_v24 = vshrl.u32 %v1852_v49, %v1400_v37  ;;  %v1406_v9 = vshrl.u32 %v1853_v52, %v1400_v37  ;;  %v1409_v5 = vshrl.u32 %v1854_v55, %v1400_v37 }
 0x19a   :  { %v1412_v60 = vshrl.u32 %v1855_v58, %v1400_v37  ;;  %vm749_vm6 = vweird.f32 %v1905_v21  ;;  %v1398_v12 = vshrl.u32 %v1397_v62, 5  ;;  %v1414_v44 = vshll.u32 %v1855_v58, %v1399_v4 }
 0x19b   :  { %v1240_v42 = vshll.u32 %v2396_v56, 30  ;;  %v1404_v6 = vor.u32 %v1403_v24, %v1402_v41  ;;  %v1407_v31 = vor.u32 %v1406_v9, %v1405_v23  ;;  %v1410_v49 = vor.u32 %v1409_v5, %v1408_v17 }
 0x19c   :  { %v1413_v29 = vor.u32 %v1412_v60, %v1411_v47  ;;  %v2646_v15 = vmov 1326507024   ;;  %v1043_v52 = vshrl.u32 %v1025_v45, %v1041_v11  ;;  %v1047_v27 = vshll.u32 %v1046_v53, 23 }
 0x19d   :  { %v1415_v40 = vshrl.u32 %v2646_v15, %v1400_v37  ;;  %v1129_v55 = vadd.s32 %v2226_v43, %v2235_v35  ;;  %v2411_v1 = vsub.s32 %v1237_v51, %v1240_v42  ;;  %v1145_v57 = vsub.s32 32, %v2385_v19 }
 0x19e   :  { %v1150_v48 = vadd.s32 127, %v1149_v3  ;;  %v2415_v62 = vsel %vm1590_vm4, 0, %v1589_v18  ;;  %vm1417_vm7 = vcmp.lt.s32.totalorder %v1398_v12, 1  ;;  %vm1420_vm8 = vcmp.lt.s32.totalorder %v1398_v12, 4 }
 0x19f   :  { %v1416_v41 = vor.u32 %v1415_v40, %v1414_v44  ;;  %v1243_v58 = vsub.s32 0, %v2411_v1  ;;  %v1433_v4 = vshll.u32 %v1393_v2, 8  ;;  %v1401_v45 = vshrl.u32 %v1851_v46, %v1400_v37 }
 0x1a0   :  { %v1422_v11 = vsel %vm1420_vm8, %v1410_v49, 2102212464  ;;  %v1425_v53 = vsel %vm1417_vm7, %v1404_v6, %v1407_v31  ;;  %v1426_v24 = vsel %vm1420_vm8, %v1413_v29, 920167782  ;;  %v1357_v43 = vsub.s32 4294967266, %v2415_v62 }
 0x1a1   :  { %v1584_v35 = vmin.u32 %v1243_v58, %v2411_v1  ;;  %vm1419_vm9 = vcmp.lt.s32.totalorder %v1398_v12, 3  ;;  %v1429_v51 = vsel %vm1417_vm7, %v1407_v31, %v1410_v49  ;;  %vm1418_vm10 = vcmp.lt.s32.totalorder %v1398_v12, 2 }
 0x1a2   :  { %v1421_v18 = vsel %vm1417_vm7, %v1401_v45, %v1404_v6  ;;  %v1427_v3 = vsel %vm1419_vm9, %v1410_v49, %v1426_v24  ;;  %v1430_v23 = vsel %vm1420_vm8, %v1416_v41, 1326507024  ;;  %v1423_v17 = vsel %vm1419_vm9, %v1407_v31, %v1422_v11 }
 0x1a3   :  { %v1245_v9 = vclz %v1584_v35  ;;  %v1428_v5 = vsel %vm1418_vm10, %v1425_v53, %v1427_v3  ;;  %v1431_v2 = vsel %vm1419_vm9, %v1413_v29, %v1430_v23  ;;  %vm867_vm11 = vcmp.lt.s32.totalorder %v1907_v0, 0 }
 0x1a4   :  { %v1432_v46 = vsel %vm1418_vm10, %v1429_v51, %v1431_v2  ;;  %v2424_v37 = vmul.u32.u64.low %v1433_v4, %v1428_v5  ;;  %v2425_v47 = vmul.u32.u64.high %v1433_v4, %v1428_v5, %v2424_v37  ;;  %v2430_v60 = vsel %vm749_vm6, nan, %v759_v25 }
 0x1a5   :  { %v1151_v42 = vshll.u32 %v1150_v48, 23  ;;  %v1585_v6 = vadd.s32 4294967294, %v1245_v9  ;;  %v2432_v44 = vmul.u32.u64.low %v1433_v4, %v1432_v46  ;;  %v2433_v49 = vmul.u32.u64.high %v1433_v4, %v1432_v46, %v2432_v44 }
 0x1a6   :  { %v949_v31 = vxor.u32 2147483648, %v2345_v34  ;;  %v951_v29 = vsub.s32 4, %v2116_v54  ;;  %v2647_v15 = vand.u32 2147483647, %v2375_v61  ;;  %v2648_v40 = vcvt.s32.f32 %v2372_v14 }
 0x1a7   :  { %v1048_v58 = vor.u32 4788187, %v1047_v27  ;;  %v2649_v21 = vshll.u32 %v2279_v33, %v2367_v39  ;;  %v1147_v45 = vshrl.u32 %v1129_v55, %v1145_v57  ;;  %vm1586_vm12 = vcmp.lt.s32.totalorder %v1585_v6, 0 }
 0x1a8   :  { %v844_v41 = vmul.f32 %v2648_v40, %v2647_v15  ;;  %v1424_v48 = vsel %vm1418_vm10, %v1421_v18, %v1423_v17  ;;  %v1146_v11 = vshll.u32 %v2304_v10, %v2385_v19  ;;  %v1358_v53 = vadd.s32 127, %v1357_v43 }
 0x1a9   :  { %v1044_v25 = vor.u32 %v1043_v52, %v2649_v21  ;;  %v1248_v24 = vsel %vm1586_vm12, 0, %v1585_v6  ;;  %v1443_v35 = vadd.s32 1, %v2425_v47  ;;  %vm763_vm13 = vcmp.lt.s32.totalorder %v1914_v32, 0 }
 0x1aa   :  { %v1152_v14 = vor.u32 4788187, %v1151_v42  ;;  %v1233_v27 = vadd.s32 %v2359_v26, %v2364_v50  ;;  %v1249_v61 = vsub.s32 32, %v1248_v24  ;;  %v1253_v33 = vsub.s32 4294967266, %v1248_v24 }
 0x1ab   :  { %v1049_v39 = vand.u32 2147483647, %v1048_v58  ;;  %v1353_v57 = vsub.s32 32, %v2415_v62  ;;  %v1440_v12 = vmul.u32 %v1433_v4, %v1424_v48  ;;  %vm1442_vm14 = vc.u32 %v2433_v49, %v2424_v37 }
 0x1ac   :  { %v1148_v10 = vor.u32 %v1147_v45, %v1146_v11  ;;  %v1251_v19 = vshrl.u32 %v1233_v27, %v1249_v61  ;;  %v1254_v52 = vadd.s32 127, %v1253_v33  ;;  %v1444_v55 = vsel %vm1442_vm14, %v1443_v35, %v2425_v47 }
 0x1ad   :  { %v1337_v43 = vadd.s32 %v2292_v22, %v2301_v8  ;;  %v1359_v51 = vshll.u32 %v1358_v53, 23  ;;  %v1250_v26 = vshll.u32 %v2411_v1, %v1248_v24  ;;  %v1445_v50 = vadd.s32 %v1444_v55, %v1440_v12 }
 0x1ae   :  { %v950_v18 = vsel %vm867_vm11, %v949_v31, %v2345_v34  ;;  %v1051_v4 = vcvt.s32.f32 %v1044_v25  ;;  %v1153_v3 = vand.u32 2147483647, %v1152_v14  ;;  %v1255_v23 = vshll.u32 %v1254_v52, 23 }
 0x1af   :  { %v845_v9 = vxor.u32 2147483648, %v844_v41  ;;  %v1355_v17 = vshrl.u32 %v1337_v43, %v1353_v57  ;;  %v1252_v5 = vor.u32 %v1251_v19, %v1250_v26  ;;  %v1446_v2 = vadd.s32 536870912, %v1445_v50 }
 0x1b0   :  { %v847_v46 = vsub.s32 4, %v2202_v28  ;;  %v1052_v47 = vmul.f32 %v1051_v4, %v1049_v39  ;;  %v1155_v42 = vcvt.s32.f32 %v1148_v10  ;;  %v1256_v22 = vor.u32 4788187, %v1255_v23 }
 0x1b1   :  { %v2650_v8 = vand.u32 2147483647, %v1907_v0  ;;  %v1354_v34 = vshll.u32 %v2349_v59, %v2415_v62  ;;  %v1360_v6 = vor.u32 4788187, %v1359_v51  ;;  %v2470_v44 = vshrl.u32 %v1446_v2, 30 }
 0x1b2   :  { %v952_v31 = vsel %vm867_vm11, %v951_v29, %v2116_v54  ;;  %v1156_v40 = vmul.f32 %v1155_v42, %v1153_v3  ;;  %v1257_v58 = vand.u32 2147483647, %v1256_v22  ;;  %v846_v21 = vsel %vm763_vm13, %v845_v9, %v844_v41 }
 0x1b3   :  { %vm2464_vm15 = vcmp.le.f32.partialorder %v2650_v8, 0.7853982  ;;  %v1356_v25 = vor.u32 %v1355_v17, %v1354_v34  ;;  %v1259_v45 = vcvt.s32.f32 %v1252_v5  ;;  %v1448_v59 = vshll.u32 %v2470_v44, 30 }
 0x1b4   :  { %v953_v15 = vsel %vm2464_vm15, %v1907_v0, %v950_v18  ;;  %v2653_v62 = vand.u32 2147483647, %v1914_v32  ;;  %v848_v54 = vsel %vm763_vm13, %v847_v46, %v2202_v28  ;;  %vm971_vm1 = vcmp.lt.s32.totalorder %v1973_v13, 0 }
 0x1b5   :  { %v1053_v29 = vxor.u32 2147483648, %v1052_v47  ;;  %v2656_v11 = vand.u32 2147483647, %v1973_v13  ;;  %v1361_v53 = vand.u32 2147483647, %v1360_v6  ;;  %v1260_v24 = vmul.f32 %v1259_v45, %v1257_v58 }
 0x1b6   :  { %vm2483_vm0 = vcmp.le.f32.partialorder %v2653_v62, 0.7853982  ;;  %v2497_v35 = vsub.s32 %v1445_v50, %v1448_v59  ;;  %v954_v14 = vsel %vm2464_vm15, 0, %v952_v31  ;;  %1771 = vcosq.f32 %v953_v15 }
 0x1b7   :  { %vm2493_vm2 = vcmp.le.f32.partialorder %v2656_v11, 0.7853982  ;;  %v849_v28 = vsel %vm2483_vm0, %v1914_v32, %v846_v21  ;;  %v1157_v27 = vxor.u32 2147483648, %v1156_v40  ;;  %1773 = vsinq.f32 %v953_v15 }
 0x1b8   :  { %v850_v61 = vsel %vm2483_vm0, 0, %v848_v54  ;;  %v1363_v33 = vcvt.s32.f32 %v1356_v25  ;;  %v1451_v39 = vsub.s32 0, %v2497_v35  ;;  %v1054_v57 = vsel %vm971_vm1, %v1053_v29, %v1052_v47 }
 0x1b9   :  { %v1055_v12 = vsub.s32 4, %v2247_v36  ;;  %vm1075_vm3 = vcmp.lt.s32.totalorder %v2139_v16, 0  ;;  %v1159_v10 = vsub.s32 4, %v2281_v7  ;;  %1775 = vcosq.f32 %v849_v28 }
 0x1ba   :  { %v1364_v19 = vmul.f32 %v1363_v33, %v1361_v53  ;;  %v1261_v52 = vxor.u32 2147483648, %v1260_v24  ;;  %v1592_v55 = vmin.u32 %v1451_v39, %v2497_v35  ;;  %v958_v43 = vadd.s32 3, %v954_v14 }
 0x1bb   :  { %1777 = vsinq.f32 %v849_v28  ;;  %v854_v51 = vadd.s32 3, %v850_v61  ;;  %v1158_v26 = vsel %vm1075_vm3, %v1157_v27, %v1156_v40  ;;  %v1057_v50 = vsel %vm2493_vm2, %v1973_v13, %v1054_v57 }
 0x1bc   :  { %v2659_v18 = vand.u32 2147483647, %v2139_v16  ;;  %v1367_v3 = vsub.s32 4, %v2333_v30  ;;  %v1453_v23 = vclz %v1592_v55  ;;  %v1056_v9 = vsel %vm971_vm1, %v1055_v12, %v2247_v36 }
 0x1bd   :  { %v1160_v17 = vsel %vm1075_vm3, %v1159_v10, %v2281_v7  ;;  %v2662_v5 = vand.u32 2147483647, %v2180_v20  ;;  %vm1179_vm6 = vcmp.lt.s32.totalorder %v2263_v63, 0  ;;  %v1365_v47 = vxor.u32 2147483648, %v1364_v19 }
 0x1be   :  { %vm2518_vm5 = vcmp.le.f32.partialorder %v2659_v18, 0.7853982  ;;  %v1262_v42 = vsel %vm1179_vm6, %v1261_v52, %v1260_v24  ;;  %v1593_v22 = vadd.s32 4294967294, %v1453_v23  ;;  %1779 = vcosq.f32 %v1057_v50 }
 0x1bf   :  { %vm2529_vm4 = vcmp.le.f32.partialorder %v2662_v5, 0.7853982  ;;  %v1161_v46 = vsel %vm2518_vm5, %v2139_v16, %v1158_v26  ;;  %vm1283_vm7 = vcmp.lt.s32.totalorder %v2180_v20, 0  ;;  %v2665_v36 = vand.u32 2147483647, %v2263_v63 }
 0x1c0   :  { %v1263_v8 = vsub.s32 4, %v2396_v56  ;;  %v1058_v1 = vsel %vm2493_vm2, 0, %v1056_v9  ;;  %1781 = vsinq.f32 %v1057_v50  ;;  %v1368_v34 = vsel %vm1283_vm7, %v1367_v3, %v2333_v30  ;;  %v2550_v6 = vpop.eup %1771 }
 0x1c1   :  { %vm2542_vm8 = vcmp.le.f32.partialorder %v2665_v36, 0.7853982  ;;  %vm1594_vm9 = vcmp.lt.s32.totalorder %v1593_v22, 0  ;;  %v1162_v31 = vsel %vm2518_vm5, 0, %v1160_v17  ;;  %1783 = vcosq.f32 %v1161_v46  ;;  %v1774_v58 = vpop.eup %1773 }
 0x1c2   :  { %v1265_v15 = vsel %vm2542_vm8, %v2263_v63, %v1262_v42  ;;  %v1456_v40 = vsel %vm1594_vm9, 0, %v1593_v22  ;;  %v1366_v21 = vsel %vm1283_vm7, %v1365_v47, %v1364_v19  ;;  %v1441_v25 = vadd.s32 %v2424_v37, %v2433_v49 }
 0x1c3   :  { %v1457_v45 = vsub.s32 32, %v1456_v40  ;;  %v1461_v59 = vsub.s32 4294967266, %v1456_v40  ;;  %v1062_v30 = vadd.s32 3, %v1058_v1  ;;  %1785 = vsinq.f32 %v1161_v46  ;;  %v1776_v54 = vpop.eup %1775 }
 0x1c4   :  { %v1370_v62 = vsel %vm2529_vm4, 0, %v1368_v34  ;;  %v1264_v48 = vsel %vm1179_vm6, %v1263_v8, %v2396_v56  ;;  %1787 = vcosq.f32 %v1265_v15  ;;  %v1458_v29 = vshll.u32 %v2497_v35, %v1456_v40 }
 0x1c5   :  { %v1459_v11 = vshrl.u32 %v1441_v25, %v1457_v45  ;;  %v1462_v41 = vadd.s32 127, %v1461_v59  ;;  %v1778_v53 = vpop.eup %1777  ;;  %v1166_v24 = vadd.s32 3, %v1162_v31  ;;  %v1369_v37 = vsel %vm2529_vm4, %v2180_v20, %v1366_v21 }
 0x1c6   :  { %1789 = vsinq.f32 %v1265_v15  ;;  %v1266_v49 = vsel %vm2542_vm8, 0, %v1264_v48  ;;  %v959_v27 = vand.u32 3, %v958_v43  ;;  %v855_v56 = vand.u32 3, %v854_v51 }
 0x1c7   :  { %v1460_v14 = vor.u32 %v1459_v11, %v1458_v29  ;;  %v1463_v28 = vshll.u32 %v1462_v41, 23  ;;  %v2570_v61 = vand.u32 3, %v1062_v30  ;;  %v1374_v33 = vadd.s32 3, %v1370_v62 }
 0x1c8   :  { %1791 = vsinq.f32 %v1369_v37  ;;  %v858_v39 = vxor.u32 2147483648, %v1778_v53  ;;  %v861_v57 = vxor.u32 2147483648, %v1776_v54  ;;  %v1780_v12 = vpop.eup %1779  ;;  %v2572_v10 = vand.u32 3, %v1166_v24 }
 0x1c9   :  { %v1464_v35 = vor.u32 4788187, %v1463_v28  ;;  %1793 = vcosq.f32 %v1369_v37  ;;  %v1270_v19 = vadd.s32 3, %v1266_v49  ;;  %vm1387_vm10 = vcmp.lt.s32.totalorder %v2326_v38, 0 }
 0x1ca   :  { %v1782_v52 = vpop.eup %1781  ;;  %v1467_v26 = vcvt.s32.f32 %v1460_v14  ;;  %v962_v50 = vxor.u32 2147483648, %v1774_v58  ;;  %v965_v43 = vxor.u32 2147483648, %v2550_v6  ;;  %v2576_v18 = vand.u32 3, %v1374_v33 }
 0x1cb   :  { %v1465_v55 = vand.u32 2147483647, %v1464_v35  ;;  %v1784_v51 = vpop.eup %1783  ;;  %v2668_v4 = vand.u32 2147483647, %v2326_v38  ;;  %vm857_vm12 = vcmp.eq.s32.totalorder %v855_v56, 0  ;;  %vm860_vm13 = vcmp.eq.s32.totalorder %v855_v56, 2 }
 0x1cc   :  { %v1471_v9 = vsub.s32 4, %v2470_v44  ;;  %v859_v17 = vsel %vm857_vm12, %v1776_v54, %v858_v39  ;;  %v862_v5 = vsel %vm860_vm13, %v861_v57, %v1778_v53  ;;  %v1271_v46 = vand.u32 3, %v1270_v19 }
 0x1cd   :  { %vm2580_vm11 = vcmp.le.f32.partialorder %v2668_v4, 0.7853982  ;;  %v1468_v23 = vmul.f32 %v1467_v26, %v1465_v55  ;;  %v1786_v2 = vpop.eup %1785  ;;  %vm856_vm14 = vcmp.lt.s32.totalorder %v855_v56, 2  ;;  %vm961_vm15 = vcmp.eq.s32.totalorder %v959_v27, 0 }
 0x1ce   :  { %vm964_vm0 = vcmp.eq.s32.totalorder %v959_v27, 2  ;;  %v1788_v47 = vpop.eup %1787  ;;  %vm853_vm1 = vweird.f32 %v1914_v32  ;;  %vm960_vm2 = vcmp.lt.s32.totalorder %v959_v27, 2  ;;  %v963_v22 = vsel %vm961_vm15, %v2550_v6, %v962_v50 }
 0x1cf   :  { %v1469_v42 = vxor.u32 2147483648, %v1468_v23  ;;  %v966_v36 = vsel %vm964_vm0, %v965_v43, %v1774_v58  ;;  %vm957_vm3 = vweird.f32 %v1907_v0  ;;  %v863_v8 = vsel %vm856_vm14, %v859_v17, %v862_v5 }
 0x1d0   :  { %v1790_v7 = vpop.eup %1789  ;;  %vm1064_vm5 = vcmp.lt.s32.totalorder %v2570_v61, 2  ;;  %v1066_v1 = vxor.u32 2147483648, %v1782_v52  ;;  %v1069_v34 = vxor.u32 2147483648, %v1780_v12  ;;  %v1472_v15 = vsel %vm1387_vm10, %v1471_v9, %v2470_v44 }
 0x1d1   :  { %v1470_v31 = vsel %vm1387_vm10, %v1469_v42, %v1468_v23  ;;  %v1170_v40 = vxor.u32 2147483648, %v1786_v2  ;;  %v1173_v21 = vxor.u32 2147483648, %v1784_v51  ;;  %v967_v58 = vsel %vm960_vm2, %v963_v22, %v966_v36 }
 0x1d2   :  { %v1473_v6 = vsel %vm2580_vm11, %v2326_v38, %v1470_v31  ;;  %vm1065_vm4 = vcmp.eq.s32.totalorder %v2570_v61, 0  ;;  %vm1068_vm6 = vcmp.eq.s32.totalorder %v2570_v61, 2  ;;  %v1792_v25 = vpop.eup %1791  ;;  %v1274_v45 = vxor.u32 2147483648, %v1790_v7 }
 0x1d3   :  { %1795 = vcosq.f32 %v1473_v6  ;;  %v1277_v59 = vxor.u32 2147483648, %v1788_v47  ;;  %v1794_v30 = vpop.eup %1793  ;;  %v1474_v62 = vsel %vm2580_vm11, 0, %v1472_v15  ;;  %vm1169_vm7 = vcmp.eq.s32.totalorder %v2572_v10, 0 }
 0x1d4   :  { %1797 = vsinq.f32 %v1473_v6  ;;  %vm1172_vm8 = vcmp.eq.s32.totalorder %v2572_v10, 2  ;;  %v1067_v44 = vsel %vm1065_vm4, %v1780_v12, %v1066_v1  ;;  %v1070_v48 = vsel %vm1068_vm6, %v1069_v34, %v1782_v52 }
 0x1d5   :  { %v1171_v54 = vsel %vm1169_vm7, %v1784_v51, %v1170_v40  ;;  %v1174_v29 = vsel %vm1172_vm8, %v1173_v21, %v1786_v2  ;;  %vm1273_vm9 = vcmp.eq.s32.totalorder %v1271_v46, 0  ;;  %vm1276_vm10 = vcmp.eq.s32.totalorder %v1271_v46, 2 }
 0x1d6   :  { %v1378_v11 = vxor.u32 2147483648, %v1792_v25  ;;  %v1857_v41 = vmov 1966171168   ;;  %v1478_v24 = vadd.s32 3, %v1474_v62  ;;  %v1275_v37 = vsel %vm1273_vm9, %v1788_v47, %v1274_v45 }
 0x1d7   :  { %v1502_v53 = vunpack.c.l.s4 %v1857_v41  ;;  %v1278_v49 = vsel %vm1276_vm10, %v1277_v59, %v1790_v7  ;;  %v1381_v14 = vxor.u32 2147483648, %v1794_v30  ;;  %vm1061_vm11 = vweird.f32 %v1973_v13 }
 0x1d8   :  { %v864_v28 = vsel %vm853_vm1, nan, %v863_v8  ;;  %v1071_v27 = vsel %vm1064_vm5, %v1067_v44, %v1070_v48  ;;  %vm1168_vm12 = vcmp.lt.s32.totalorder %v2572_v10, 2  ;;  %v968_v56 = vsel %vm957_vm3, nan, %v967_v58 }
 0x1d9   :  { %v1175_v33 = vsel %vm1168_vm12, %v1171_v54, %v1174_v29  ;;  %vm1272_vm13 = vcmp.lt.s32.totalorder %v1271_v46, 2  ;;  %vm1377_vm14 = vcmp.eq.s32.totalorder %v2576_v18, 0  ;;  %vm1380_vm15 = vcmp.eq.s32.totalorder %v2576_v18, 2 }
 0x1da   :  { %v1279_v35 = vsel %vm1272_vm13, %v1275_v37, %v1278_v49  ;;  %v1503_v39 = vunpack.c.0.s8 %v1502_v53  ;;  %v2671_v13 = vlaneseq  ;;  %v1479_v32 = vand.u32 3, %v1478_v24 }
 0x1db   :  { %v1072_v12 = vsel %vm1061_vm11, nan, %v1071_v27  ;;  %v1379_v19 = vsel %vm1377_vm14, %v1794_v30, %v1378_v11  ;;  %v1382_v61 = vsel %vm1380_vm15, %v1381_v14, %v1792_v25  ;;  %vm1165_vm0 = vweird.f32 %v2139_v16 }
 0x1dc   :  { %v1505_v57 = vshrl.u32 %v2671_v13, 7  ;;  %vm1269_vm1 = vweird.f32 %v2263_v63  ;;  %v1176_v10 = vsel %vm1165_vm0, nan, %v1175_v33  ;;  %vm1376_vm2 = vcmp.lt.s32.totalorder %v2576_v18, 2 }
 0x1dd   :  { %v1796_v0 = vpop.eup %1795  ;;  %v1280_v52 = vsel %vm1269_vm1, nan, %v1279_v35  ;;  %v1497_v55 = vcombine.low %v2430_v60, %v864_v28  ;;  %v1383_v50 = vsel %vm1376_vm2, %v1379_v19, %v1382_v61  ;;  %v1498_v51 = vcombine.low %v968_v56, %v1072_v12 }
 0x1de   :  { %v1798_v26 = vpop.eup %1797  ;;  %v1485_v43 = vxor.u32 2147483648, %v1796_v0  ;;  %v1506_v4 = vsub.s32 %v1503_v39, %v1505_v57  ;;  %vm1484_vm3 = vcmp.eq.s32.totalorder %v1479_v32, 2  ;;  %vm1373_vm5 = vweird.f32 %v2180_v20 }
 0x1df   :  { %v1482_v3 = vxor.u32 2147483648, %v1798_v26  ;;  %vm1481_vm4 = vcmp.eq.s32.totalorder %v1479_v32, 0  ;;  %v1499_v23 = vcombine.low %v1176_v10, %v1280_v52  ;;  %v1384_v63 = vsel %vm1373_vm5, nan, %v1383_v50 }
 0x1e0   :  { %v1486_v16 = vsel %vm1484_vm3, %v1485_v43, %v1798_v26  ;;  %vm1480_vm6 = vcmp.lt.s32.totalorder %v1479_v32, 2  ;;  %vm1477_vm7 = vweird.f32 %v2326_v38  ;;  %v1507_v17 = vrot.slane %v1497_v55, %v1506_v4 }
 0x1e1   :  { %v1483_v9 = vsel %vm1481_vm4, %v1796_v0, %v1482_v3  ;;  %v1514_v60 = vrot.slane %v1498_v51, %v1506_v4  ;;  %v1521_v46 = vrot.slane %v1499_v23, %v1506_v4 }
 0x1e2   :  { %v1487_v18 = vsel %vm1480_vm6, %v1483_v9, %v1486_v16 }
 0x1e3   :  { %v1488_v5 = vsel %vm1477_vm7, nan, %v1487_v18  ;;  %v1529_v42 = vcombine.low %v1507_v17, %v1514_v60 }
 0x1e4   :  { %v1500_v2 = vcombine.low %v1384_v63, %v1488_v5 }
 0x1e5   :  { %v1537_v20 = vrot.slane %v1529_v42, %v1506_v4 }
 0x1e6   :  { %v1528_v47 = vrot.slane %v1500_v2, %v1506_v4 }
 0x1e8   :  { %v1530_v22 = vcombine.low %v1521_v46, %v1528_v47 }
 0x1ea   :  { %v1544_v36 = vrot.slane %v1530_v22, %v1506_v4 }
 0x1ec   :  { %v1545_v7 = vcombine.low %v1537_v20, %v1544_v36 }
 0x1ee   :  { %1547 = vst [vmem:[#allocation5] sm:$0xff] %v1545_v7 }
 0x1ef   :  { %1832 = shalt.err (!%p1829_p12)
}
 0x1f0   :  { %s1833_s28 = scalar_lea.hbm %s2634_s2, 128 }
 0x1f1   :  { %p1834_p13 = scmp.ne.s32.totalorder %s2634_s2, %s1833_s28  ;;  %p1837_p0 = scmp.lt.u32.totalorder %s1833_s28, %s2634_s2 }
 0x1f3   :  { %p1839_p1 = pnand %p1837_p0, %p1834_p13 }
 0x1f5   :  { %1842 = shalt.err (!%p1839_p1)
}
 0x1f6   :  { %1557 = dma.vmem_to_hbm [thread:$0]  %s1555_s24, 128, %s2634_s2, [#allocation4]  }
 0x1f7   :  { %1845 = dma.done.wait [#allocation4], 128  }
 0x1f8   :  { %1846 = vsyncadd [#allocation4], 4294967168 }
 0x1f9   :  { %1561 = vsyncpa [#allocation3], 1 }
 0x1fa   :  { %1562 = vsyncpa [#allocation4], 1 }

</bundles_post_ra>
